<compile_context>
chip_gen: v7x
topology: tpu7x:2x2x1
jax: 0.10.0
libtpu: 0.0.40
codegen_flags: <defaults>
</compile_context>

<pallas_src>
import functools

import jax
import jax.numpy as jnp
from jax.experimental import pallas as pl
from jax.experimental.pallas import tpu as pltpu

EPS = 1e-5


def _round_up(v, m):
    return (v + m - 1) // m * m


# ---------------------------------------------------------------------------
# Fused Pallas kernel: one batch element per grid step, everything in VMEM.
# ---------------------------------------------------------------------------
def _se_bottleneck_ibn_kernel(
        x_ref, w1_ref, affp_ref, w2_ref, affc_ref, w3_ref, fc1_ref, fc2_ref,
        o_ref, *, H, W, pad):
    """affp packs [IN gamma, IN beta, BN1 scale, BN1 shift, BN2 scale, BN2 shift]
    rows of width P; IBN params are pre-padded to full channel width (IN affine
    on the first `half` channels and zeros elsewhere, folded BN on the rest and
    zeros on the first half), so no in-kernel channel split/concat is needed.
    affc packs [BN3 scale, BN3 shift] rows of width C4."""
    HW = H * W
    P = w1_ref.shape[1]
    bf16 = jnp.bfloat16

    affp = affp_ref[...]                                   # (6, P)  f32
    ing, inb = affp[0:1], affp[1:2]
    bn1s, bn1sh = affp[2:3], affp[3:4]
    bn2s, bn2sh = affp[4:5], affp[5:6]
    affc = affc_ref[...]                                   # (2, C4) f32
    bn3s, bn3sh = affc[0:1], affc[1:2]

    x = x_ref[0]                                           # (HW, Cin) f32 (residual)

    # ---- stage 1: conv1 (1x1) + IBN('a') + ReLU --------------------------
    y = jnp.dot(x.astype(bf16), w1_ref[...],
                preferred_element_type=jnp.float32)        # (HW, P) f32
    mu = jnp.mean(y, axis=0, keepdims=True)                # (1, P)
    d = y - mu
    var = jnp.mean(d * d, axis=0, keepdims=True)           # two-pass (stable)
    in_scale = ing * jax.lax.rsqrt(var + EPS)
    scale = in_scale + bn1s
    shift = (inb - mu * in_scale) + bn1sh
    y1 = jnp.maximum(y * scale + shift, 0.0)               # (HW, P) f32

    # ---- stage 2: conv2 (3x3, pad=1) as 9 accumulating MXU matmuls -------
    # Zero-pad y1 by `pad` rows on each side so every (dy, dx) tap is a static
    # row-shifted slice; the W-boundary wrap of the dx shift is killed by a
    # lane-broadcast column mask.  Top/bottom borders read the zero padding.
    zpad = jnp.zeros((pad, P), jnp.float32)
    ypad = jnp.concatenate([zpad, y1, zpad], axis=0)       # (HW + 2*pad, P)

    col = jax.lax.broadcasted_iota(jnp.int32, (HW, 1), 0) % W
    not_first_col = col > 0            # valid source for dx == -1
    not_last_col = col < (W - 1)       # valid source for dx == +1

    acc = jnp.zeros((HW, P), jnp.float32)
    t = 0
    for dy in (-1, 0, 1):
        for dx in (-1, 0, 1):
            s = pad + dy * W + dx
            tap = ypad[s:s + HW, :]                        # (HW, P) f32
            if dx == -1:
                tap = jnp.where(not_first_col, tap, 0.0)
            elif dx == 1:
                tap = jnp.where(not_last_col, tap, 0.0)
            acc = acc + jnp.dot(tap.astype(bf16), w2_ref[t],
                                preferred_element_type=jnp.float32)
            t += 1
    y2 = jnp.maximum(acc * bn2s + bn2sh, 0.0)              # (HW, P) f32

    # ---- stage 3: conv3 (1x1) + BN + SE + residual + ReLU ----------------
    z = jnp.dot(y2.astype(bf16), w3_ref[...],
                preferred_element_type=jnp.float32)        # (HW, C4) f32
    z = z * bn3s + bn3sh
    pooled = jnp.mean(z, axis=0, keepdims=True)            # (1, C4)
    h = jnp.maximum(
        jnp.dot(pooled.astype(bf16), fc1_ref[...],
                preferred_element_type=jnp.float32), 0.0)  # (1, red)
    pre = jnp.dot(h.astype(bf16), fc2_ref[...],
                  preferred_element_type=jnp.float32)      # (1, C4)
    gate = 1.0 / (1.0 + jnp.exp(-pre))                     # exact sigmoid
    o_ref[0] = jnp.maximum(z * gate + x, 0.0)              # residual + ReLU


# ---------------------------------------------------------------------------
# Wrapper
# ---------------------------------------------------------------------------
def se_bottleneck_ibn_forward(x_nchw, params):
    N, Cin, H, W = x_nchw.shape
    P = params["w1"].shape[1]
    C4 = params["w3"].shape[1]
    red = params["fc1"].shape[1]
    HW = H * W
    assert Cin == C4, "downsample=None requires inplanes == planes * 4"

    x_flat = jnp.transpose(x_nchw, (0, 2, 3, 1)).reshape(N, HW, Cin)

    # bf16 matmul operands (f32 master params), f32 accumulation inside kernel.
    w1 = params["w1"].astype(jnp.bfloat16)        # (Cin, P)
    w2 = params["w2"].astype(jnp.bfloat16)        # (9, P, P), tap t=(dy+1)*3+(dx+1)
    w3 = params["w3"].astype(jnp.bfloat16)        # (P, C4)
    fc1 = params["fc1"].astype(jnp.bfloat16)      # (C4, red)
    fc2 = params["fc2"].astype(jnp.bfloat16)      # (red, C4)

    # Pack the small per-channel affine vectors (fewer inputs / DMA descriptors).
    affp = jnp.concatenate(
        [params["in_gamma_pad"], params["in_beta_pad"],
         params["bn1_scale_pad"], params["bn1_shift_pad"],
         params["bn2_scale"], params["bn2_shift"]], axis=0)       # (6, P)
    affc = jnp.concatenate(
        [params["bn3_scale"], params["bn3_shift"]], axis=0)       # (2, C4)

    pad = _round_up(W + 1, 8)     # zero-pad rows on each side of the flat image
    kernel = functools.partial(_se_bottleneck_ibn_kernel, H=H, W=W, pad=pad)

    out_flat = pl.pallas_call(
        kernel,
        out_shape=jax.ShapeDtypeStruct((N, HW, C4), jnp.float32),
        grid=(N,),
        in_specs=[
            pl.BlockSpec((1, HW, Cin), lambda b: (b, 0, 0)),   # x (also residual)
            pl.BlockSpec((Cin, P), lambda b: (0, 0)),          # w1 (bf16)
            pl.BlockSpec((6, P), lambda b: (0, 0)),            # packed IN/BN1/BN2
            pl.BlockSpec((9, P, P), lambda b: (0, 0, 0)),      # w2 per-tap (bf16)
            pl.BlockSpec((2, C4), lambda b: (0, 0)),           # packed BN3
            pl.BlockSpec((P, C4), lambda b: (0, 0)),           # w3 (bf16)
            pl.BlockSpec((C4, red), lambda b: (0, 0)),         # SE fc1 (bf16)
            pl.BlockSpec((red, C4), lambda b: (0, 0)),         # SE fc2 (bf16)
        ],
        out_specs=pl.BlockSpec((1, HW, C4), lambda b: (b, 0, 0)),
        compiler_params=pltpu.CompilerParams(
            dimension_semantics=("parallel",)),
    )(x_flat, w1, affp, w2, affc, w3, fc1, fc2)

    return jnp.transpose(out_flat.reshape(N, H, W, C4), (0, 3, 1, 2))


# ---------------------------------------------------------------------------
# Deterministic parameter initialization (shapes follow the PyTorch module)
# ---------------------------------------------------------------------------
def init_params(key, inplanes, planes, reduction=16):
    half = int(planes * 0.5)
    rest = planes - half
    c4 = planes * 4
    red = int(c4 / reduction)
    ks = jax.random.split(key, 20)
    nrm = lambda k, s, sc=0.1: sc * jax.random.normal(k, s, jnp.float32)
    uni = lambda k, s: jax.random.uniform(k, s, jnp.float32, 0.5, 1.5)

    def fold_bn(g, b, m, v):
        scale = g / jnp.sqrt(v + EPS)
        return scale, b - m * scale

    # conv1 (1x1): weight (planes, inplanes, 1, 1) -> matmul form (inplanes, planes)
    w1 = nrm(ks[0], (inplanes, planes))
    # IBN: InstanceNorm affine on first half, folded BatchNorm on second half.
    in_gamma = 1.0 + nrm(ks[1], (half,))
    in_beta = nrm(ks[2], (half,))
    bn1_s, bn1_sh = fold_bn(1.0 + nrm(ks[3], (rest,)), nrm(ks[4], (rest,)),
                            nrm(ks[5], (rest,)), uni(ks[6], (rest,)))
    z_half = jnp.zeros((half,), jnp.float32)
    z_rest = jnp.zeros((rest,), jnp.float32)
    in_gamma_pad = jnp.concatenate([in_gamma, z_rest]).reshape(1, planes)
    in_beta_pad = jnp.concatenate([in_beta, z_rest]).reshape(1, planes)
    bn1_scale_pad = jnp.concatenate([z_half, bn1_s]).reshape(1, planes)
    bn1_shift_pad = jnp.concatenate([z_half, bn1_sh]).reshape(1, planes)

    # conv2 (3x3): per-tap (Cin, Cout) matrices, tap order t = (dy+1)*3 + (dx+1)
    w2 = nrm(ks[7], (9, planes, planes))
    bn2_s, bn2_sh = fold_bn(1.0 + nrm(ks[8], (planes,)), nrm(ks[9], (planes,)),
                            nrm(ks[10], (planes,)), uni(ks[11], (planes,)))
    # conv3 (1x1)
    w3 = nrm(ks[12], (planes, c4))
    bn3_s, bn3_sh = fold_bn(1.0 + nrm(ks[13], (c4,)), nrm(ks[14], (c4,)),
                            nrm(ks[15], (c4,)), uni(ks[16], (c4,)))
    # SE: Linear(c4 -> red, no bias), Linear(red -> c4, no bias); y = x @ W.T
    fc1 = nrm(ks[17], (c4, red))
    fc2 = nrm(ks[18], (red, c4))

    return dict(
        w1=w1,
        in_gamma_pad=in_gamma_pad, in_beta_pad=in_beta_pad,
        bn1_scale_pad=bn1_scale_pad, bn1_shift_pad=bn1_shift_pad,
        w2=w2,
        bn2_scale=bn2_s.reshape(1, planes), bn2_shift=bn2_sh.reshape(1, planes),
        w3=w3,
        bn3_scale=bn3_s.reshape(1, c4), bn3_shift=bn3_sh.reshape(1, c4),
        fc1=fc1, fc2=fc2,
    )


# ---------------------------------------------------------------------------
# Pure-JAX reference (same math and the same bf16-operand / f32-accumulate
# mixed precision as the kernel, no Pallas) for a tight correctness check.
# ---------------------------------------------------------------------------
def reference_forward(x_nchw, params):
    N, Cin, H, W = x_nchw.shape
    P = params["w1"].shape[1]
    C4 = params["w3"].shape[1]
    bf16, f32 = jnp.bfloat16, jnp.float32
    x = jnp.transpose(x_nchw, (0, 2, 3, 1)).astype(f32)               # NHWC

    w1 = params["w1"].astype(bf16)
    w2 = params["w2"].astype(bf16)
    w3 = params["w3"].astype(bf16)
    fc1 = params["fc1"].astype(bf16)
    fc2 = params["fc2"].astype(bf16)

    y = jnp.einsum("nhwc,cp->nhwp", x.astype(bf16), w1,
                   preferred_element_type=f32)
    mu = jnp.mean(y, axis=(1, 2), keepdims=True)
    var = jnp.mean((y - mu) ** 2, axis=(1, 2), keepdims=True)
    ing = params["in_gamma_pad"].reshape(1, 1, 1, P)
    inb = params["in_beta_pad"].reshape(1, 1, 1, P)
    bns = params["bn1_scale_pad"].reshape(1, 1, 1, P)
    bnsh = params["bn1_shift_pad"].reshape(1, 1, 1, P)
    in_scale = ing / jnp.sqrt(var + EPS)
    y1 = jnp.maximum(y * (in_scale + bns) + (inb - mu * in_scale) + bnsh, 0.0)

    yp = jnp.pad(y1.astype(bf16), ((0, 0), (1, 1), (1, 1), (0, 0)))
    acc = jnp.zeros((N, H, W, P), f32)
    for ky in range(3):
        for kx in range(3):
            acc = acc + jnp.einsum("nhwc,cp->nhwp",
                                   yp[:, ky:ky + H, kx:kx + W, :],
                                   w2[ky * 3 + kx], preferred_element_type=f32)
    y2 = jnp.maximum(acc * params["bn2_scale"].reshape(1, 1, 1, P)
                     + params["bn2_shift"].reshape(1, 1, 1, P), 0.0)

    z = jnp.einsum("nhwc,cp->nhwp", y2.astype(bf16), w3,
                   preferred_element_type=f32)
    z = z * params["bn3_scale"].reshape(1, 1, 1, C4) \
        + params["bn3_shift"].reshape(1, 1, 1, C4)
    pooled = jnp.mean(z, axis=(1, 2))                                  # (N, C4)
    h = jnp.maximum(jnp.einsum("nc,cr->nr", pooled.astype(bf16), fc1,
                               preferred_element_type=f32), 0.0)
    pre = jnp.einsum("nr,rc->nc", h.astype(bf16), fc2,
                     preferred_element_type=f32)
    gate = 1.0 / (1.0 + jnp.exp(-pre))
    out = jnp.maximum(z * gate[:, None, None, :] + x, 0.0)
    return jnp.transpose(out, (0, 3, 1, 2))


if __name__ == "__main__":
    # SEBottleneck_IBN(inplanes=128, planes=32, stride=1, downsample=None,
    #                  ibn='a', reduction=16)  -> C4 = 128 (lane-dense output).
    N, inplanes, planes, H, W = 2, 128, 32, 8, 8

    key = jax.random.PRNGKey(0)
    k_x, k_p = jax.random.split(key)
    x = jax.random.normal(k_x, (N, inplanes, H, W), jnp.float32)       # NCHW
    params = init_params(k_p, inplanes, planes, reduction=16)

    fwd = jax.jit(se_bottleneck_ibn_forward)
    ref_fn = jax.jit(reference_forward)
    out = jax.block_until_ready(fwd(x, params))
    ref = jax.block_until_ready(ref_fn(x, params))

    assert out.shape == (N, planes * 4, H, W), out.shape
    max_err = float(jnp.max(jnp.abs(out - ref)))
    assert max_err < 5e-2, f"mismatch vs reference: {max_err}"
    print("KERNEL_OK")
</pallas_src>

<mosaic_0001>
module attributes {stable_mosaic.version = 11 : i64} {
  func.func @_se_bottleneck_ibn_kernel(%arg0: i32, %arg1: memref<1x64x128xf32, #tpu.memory_space<vmem>>, %arg2: memref<128x32xbf16, #tpu.memory_space<vmem>>, %arg3: memref<6x32xf32, #tpu.memory_space<vmem>>, %arg4: memref<9x32x32xbf16, #tpu.memory_space<vmem>>, %arg5: memref<2x128xf32, #tpu.memory_space<vmem>>, %arg6: memref<32x128xbf16, #tpu.memory_space<vmem>>, %arg7: memref<128x8xbf16, #tpu.memory_space<vmem>>, %arg8: memref<8x128xbf16, #tpu.memory_space<vmem>>, %arg9: memref<1x64x128xf32, #tpu.memory_space<vmem>>) attributes {dimension_semantics = [#tpu.dimension_semantics<parallel>], iteration_bounds = array<i64: 2>, scalar_prefetch = 0 : i64, scratch_operands = 0 : i64, tpu.core_type = #tpu.core_type<tc>, window_params = [{transform_indices = @transform_0, window_bounds = array<i64: 1, 64, 128>}, {pipeline_mode = #tpu.pipeline_mode<synchronous>, transform_indices = @transform_1, window_bounds = array<i64: 128, 32>}, {pipeline_mode = #tpu.pipeline_mode<synchronous>, transform_indices = @transform_2, window_bounds = array<i64: 6, 32>}, {pipeline_mode = #tpu.pipeline_mode<synchronous>, transform_indices = @transform_3, window_bounds = array<i64: 9, 32, 32>}, {pipeline_mode = #tpu.pipeline_mode<synchronous>, transform_indices = @transform_4, window_bounds = array<i64: 2, 128>}, {pipeline_mode = #tpu.pipeline_mode<synchronous>, transform_indices = @transform_5, window_bounds = array<i64: 32, 128>}, {pipeline_mode = #tpu.pipeline_mode<synchronous>, transform_indices = @transform_6, window_bounds = array<i64: 128, 8>}, {pipeline_mode = #tpu.pipeline_mode<synchronous>, transform_indices = @transform_7, window_bounds = array<i64: 8, 128>}, {transform_indices = @transform_8, window_bounds = array<i64: 1, 64, 128>}]} {
    %c0 = arith.constant 0 : index
    %c0_0 = arith.constant 0 : index
    %0 = vector.load %arg3[%c0, %c0_0] : memref<6x32xf32, #tpu.memory_space<vmem>>, vector<6x32xf32>
    %1 = vector.extract_strided_slice %0 {offsets = [0, 0], sizes = [1, 32], strides = [1, 1]} : vector<6x32xf32> to vector<1x32xf32>
    %2 = vector.extract_strided_slice %0 {offsets = [1, 0], sizes = [1, 32], strides = [1, 1]} : vector<6x32xf32> to vector<1x32xf32>
    %3 = vector.extract_strided_slice %0 {offsets = [2, 0], sizes = [1, 32], strides = [1, 1]} : vector<6x32xf32> to vector<1x32xf32>
    %4 = vector.extract_strided_slice %0 {offsets = [3, 0], sizes = [1, 32], strides = [1, 1]} : vector<6x32xf32> to vector<1x32xf32>
    %5 = vector.extract_strided_slice %0 {offsets = [4, 0], sizes = [1, 32], strides = [1, 1]} : vector<6x32xf32> to vector<1x32xf32>
    %6 = vector.extract_strided_slice %0 {offsets = [5, 0], sizes = [1, 32], strides = [1, 1]} : vector<6x32xf32> to vector<1x32xf32>
    %c0_1 = arith.constant 0 : index
    %c0_2 = arith.constant 0 : index
    %7 = vector.load %arg5[%c0_1, %c0_2] : memref<2x128xf32, #tpu.memory_space<vmem>>, vector<2x128xf32>
    %8 = vector.extract_strided_slice %7 {offsets = [0, 0], sizes = [1, 128], strides = [1, 1]} : vector<2x128xf32> to vector<1x128xf32>
    %9 = vector.extract_strided_slice %7 {offsets = [1, 0], sizes = [1, 128], strides = [1, 1]} : vector<2x128xf32> to vector<1x128xf32>
    %c0_3 = arith.constant 0 : index
    %c0_4 = arith.constant 0 : index
    %c0_5 = arith.constant 0 : index
    %10 = vector.load %arg1[%c0_3, %c0_4, %c0_5] : memref<1x64x128xf32, #tpu.memory_space<vmem>>, vector<1x64x128xf32>
    %11 = vector.shape_cast %10 : vector<1x64x128xf32> to vector<64x128xf32>
    %12 = arith.truncf %11 : vector<64x128xf32> to vector<64x128xbf16>
    %c0_6 = arith.constant 0 : index
    %c0_7 = arith.constant 0 : index
    %13 = vector.load %arg2[%c0_6, %c0_7] : memref<128x32xbf16, #tpu.memory_space<vmem>>, vector<128x32xbf16>
    %cst = arith.constant dense<0.000000e+00> : vector<64x32xf32>
    %14 = tpu.matmul %12, %13, %cst {dimension_numbers = #tpu.dot_dimension_numbers<[1], [0], [0], [1], [0, 0, 1, 1], [], []>} : vector<64x128xbf16>, vector<128x32xbf16>, vector<64x32xf32> -> vector<64x32xf32>
    %cst_8 = arith.constant dense<0.000000e+00> : vector<32xf32>
    %15 = vector.multi_reduction <add>, %14, %cst_8 [0] : vector<64x32xf32> to vector<32xf32>
    %16 = vector.shape_cast %15 : vector<32xf32> to vector<1x32xf32>
    %cst_9 = arith.constant 6.400000e+01 : f32
    %17 = vector.broadcast %cst_9 : f32 to vector<1x32xf32>
    %18 = arith.divf %16, %17 : vector<1x32xf32>
    %19 = vector.broadcast %18 : vector<1x32xf32> to vector<64x32xf32>
    %20 = arith.subf %14, %19 : vector<64x32xf32>
    %21 = arith.mulf %20, %20 : vector<64x32xf32>
    %cst_10 = arith.constant dense<0.000000e+00> : vector<32xf32>
    %22 = vector.multi_reduction <add>, %21, %cst_10 [0] : vector<64x32xf32> to vector<32xf32>
    %23 = vector.shape_cast %22 : vector<32xf32> to vector<1x32xf32>
    %cst_11 = arith.constant 6.400000e+01 : f32
    %24 = vector.broadcast %cst_11 : f32 to vector<1x32xf32>
    %25 = arith.divf %23, %24 : vector<1x32xf32>
    %cst_12 = arith.constant 9.99999974E-6 : f32
    %26 = vector.broadcast %cst_12 : f32 to vector<1x32xf32>
    %27 = arith.addf %25, %26 : vector<1x32xf32>
    %28 = math.rsqrt %27 : vector<1x32xf32>
    %29 = arith.mulf %1, %28 : vector<1x32xf32>
    %30 = arith.addf %29, %3 : vector<1x32xf32>
    %31 = arith.mulf %18, %29 : vector<1x32xf32>
    %32 = arith.subf %2, %31 : vector<1x32xf32>
    %33 = arith.addf %32, %4 : vector<1x32xf32>
    %34 = vector.broadcast %30 : vector<1x32xf32> to vector<64x32xf32>
    %35 = arith.mulf %14, %34 : vector<64x32xf32>
    %36 = vector.broadcast %33 : vector<1x32xf32> to vector<64x32xf32>
    %37 = arith.addf %35, %36 : vector<64x32xf32>
    %cst_13 = arith.constant 0.000000e+00 : f32
    %38 = vector.broadcast %cst_13 : f32 to vector<64x32xf32>
    %39 = arith.maximumf %37, %38 : vector<64x32xf32>
    %cst_14 = arith.constant 0.000000e+00 : f32
    %40 = vector.broadcast %cst_14 : f32 to vector<16x32xf32>
    %41 = tpu.concatenate %40, %39, %40 in 0 : vector<16x32xf32>, vector<64x32xf32>, vector<16x32xf32> -> vector<96x32xf32>
    %42 = tpu.iota {dimensions = array<i32: 0>} : vector<64x1xi32>
    %c8_i32 = arith.constant 8 : i32
    %c0_i32 = arith.constant 0 : i32
    %43 = arith.cmpi eq, %c8_i32, %c0_i32 : i32
    %c1_i32 = arith.constant 1 : i32
    %44 = arith.select %43, %c1_i32, %c8_i32 : i32
    %45 = vector.broadcast %44 : i32 to vector<64x1xi32>
    %46 = arith.remsi %42, %45 : vector<64x1xi32>
    %c0_i32_15 = arith.constant 0 : i32
    %47 = vector.broadcast %c0_i32_15 : i32 to vector<64x1xi32>
    %48 = arith.cmpi ne, %46, %47 : vector<64x1xi32>
    %c0_i32_16 = arith.constant 0 : i32
    %49 = vector.broadcast %c0_i32_16 : i32 to vector<64x1xi32>
    %50 = arith.cmpi slt, %46, %49 : vector<64x1xi32>
    %c0_i32_17 = arith.constant 0 : i32
    %51 = arith.cmpi slt, %44, %c0_i32_17 : i32
    %52 = vector.broadcast %51 : i1 to vector<64x1xi1>
    %53 = vector.broadcast %52 : vector<64x1xi1> to vector<64x1xi1>
    %54 = arith.xori %50, %53 : vector<64x1xi1>
    %55 = arith.andi %54, %48 : vector<64x1xi1>
    %56 = vector.broadcast %44 : i32 to vector<64x1xi32>
    %57 = arith.addi %46, %56 : vector<64x1xi32>
    %58 = arith.select %55, %57, %46 : vector<64x1xi1>, vector<64x1xi32>
    %c0_i32_18 = arith.constant 0 : i32
    %59 = vector.broadcast %c0_i32_18 : i32 to vector<64x1xi32>
    %60 = arith.cmpi sgt, %58, %59 : vector<64x1xi32>
    %c7_i32 = arith.constant 7 : i32
    %61 = vector.broadcast %c7_i32 : i32 to vector<64x1xi32>
    %62 = arith.cmpi slt, %58, %61 : vector<64x1xi32>
    %cst_19 = arith.constant 0.000000e+00 : f32
    %63 = vector.broadcast %cst_19 : f32 to vector<64x32xf32>
    %64 = vector.extract_strided_slice %41 {offsets = [7, 0], sizes = [64, 32], strides = [1, 1]} : vector<96x32xf32> to vector<64x32xf32>
    %cst_20 = arith.constant 0.000000e+00 : f32
    %65 = vector.shape_cast %60 : vector<64x1xi1> to vector<64x1xi1>
    %66 = vector.broadcast %65 : vector<64x1xi1> to vector<64x32xi1>
    %67 = vector.broadcast %cst_20 : f32 to vector<64x32xf32>
    %68 = arith.select %66, %64, %67 : vector<64x32xi1>, vector<64x32xf32>
    %69 = arith.truncf %68 : vector<64x32xf32> to vector<64x32xbf16>
    %c0_21 = arith.constant 0 : index
    %c0_22 = arith.constant 0 : index
    %c0_23 = arith.constant 0 : index
    %70 = vector.load %arg4[%c0_21, %c0_22, %c0_23] : memref<9x32x32xbf16, #tpu.memory_space<vmem>>, vector<1x32x32xbf16>
    %71 = vector.shape_cast %70 : vector<1x32x32xbf16> to vector<32x32xbf16>
    %cst_24 = arith.constant dense<0.000000e+00> : vector<64x32xf32>
    %72 = tpu.matmul %69, %71, %cst_24 {dimension_numbers = #tpu.dot_dimension_numbers<[1], [0], [0], [1], [0, 0, 1, 1], [], []>} : vector<64x32xbf16>, vector<32x32xbf16>, vector<64x32xf32> -> vector<64x32xf32>
    %73 = arith.addf %63, %72 : vector<64x32xf32>
    %74 = vector.extract_strided_slice %41 {offsets = [8, 0], sizes = [64, 32], strides = [1, 1]} : vector<96x32xf32> to vector<64x32xf32>
    %75 = arith.truncf %74 : vector<64x32xf32> to vector<64x32xbf16>
    %c1 = arith.constant 1 : index
    %c0_25 = arith.constant 0 : index
    %c0_26 = arith.constant 0 : index
    %76 = vector.load %arg4[%c1, %c0_25, %c0_26] : memref<9x32x32xbf16, #tpu.memory_space<vmem>>, vector<1x32x32xbf16>
    %77 = vector.shape_cast %76 : vector<1x32x32xbf16> to vector<32x32xbf16>
    %cst_27 = arith.constant dense<0.000000e+00> : vector<64x32xf32>
    %78 = tpu.matmul %75, %77, %cst_27 {dimension_numbers = #tpu.dot_dimension_numbers<[1], [0], [0], [1], [0, 0, 1, 1], [], []>} : vector<64x32xbf16>, vector<32x32xbf16>, vector<64x32xf32> -> vector<64x32xf32>
    %79 = arith.addf %73, %78 : vector<64x32xf32>
    %80 = vector.extract_strided_slice %41 {offsets = [9, 0], sizes = [64, 32], strides = [1, 1]} : vector<96x32xf32> to vector<64x32xf32>
    %cst_28 = arith.constant 0.000000e+00 : f32
    %81 = vector.shape_cast %62 : vector<64x1xi1> to vector<64x1xi1>
    %82 = vector.broadcast %81 : vector<64x1xi1> to vector<64x32xi1>
    %83 = vector.broadcast %cst_28 : f32 to vector<64x32xf32>
    %84 = arith.select %82, %80, %83 : vector<64x32xi1>, vector<64x32xf32>
    %85 = arith.truncf %84 : vector<64x32xf32> to vector<64x32xbf16>
    %c2 = arith.constant 2 : index
    %c0_29 = arith.constant 0 : index
    %c0_30 = arith.constant 0 : index
    %86 = vector.load %arg4[%c2, %c0_29, %c0_30] : memref<9x32x32xbf16, #tpu.memory_space<vmem>>, vector<1x32x32xbf16>
    %87 = vector.shape_cast %86 : vector<1x32x32xbf16> to vector<32x32xbf16>
    %cst_31 = arith.constant dense<0.000000e+00> : vector<64x32xf32>
    %88 = tpu.matmul %85, %87, %cst_31 {dimension_numbers = #tpu.dot_dimension_numbers<[1], [0], [0], [1], [0, 0, 1, 1], [], []>} : vector<64x32xbf16>, vector<32x32xbf16>, vector<64x32xf32> -> vector<64x32xf32>
    %89 = arith.addf %79, %88 : vector<64x32xf32>
    %90 = vector.extract_strided_slice %41 {offsets = [15, 0], sizes = [64, 32], strides = [1, 1]} : vector<96x32xf32> to vector<64x32xf32>
    %cst_32 = arith.constant 0.000000e+00 : f32
    %91 = vector.shape_cast %60 : vector<64x1xi1> to vector<64x1xi1>
    %92 = vector.broadcast %91 : vector<64x1xi1> to vector<64x32xi1>
    %93 = vector.broadcast %cst_32 : f32 to vector<64x32xf32>
    %94 = arith.select %92, %90, %93 : vector<64x32xi1>, vector<64x32xf32>
    %95 = arith.truncf %94 : vector<64x32xf32> to vector<64x32xbf16>
    %c3 = arith.constant 3 : index
    %c0_33 = arith.constant 0 : index
    %c0_34 = arith.constant 0 : index
    %96 = vector.load %arg4[%c3, %c0_33, %c0_34] : memref<9x32x32xbf16, #tpu.memory_space<vmem>>, vector<1x32x32xbf16>
    %97 = vector.shape_cast %96 : vector<1x32x32xbf16> to vector<32x32xbf16>
    %cst_35 = arith.constant dense<0.000000e+00> : vector<64x32xf32>
    %98 = tpu.matmul %95, %97, %cst_35 {dimension_numbers = #tpu.dot_dimension_numbers<[1], [0], [0], [1], [0, 0, 1, 1], [], []>} : vector<64x32xbf16>, vector<32x32xbf16>, vector<64x32xf32> -> vector<64x32xf32>
    %99 = arith.addf %89, %98 : vector<64x32xf32>
    %100 = vector.extract_strided_slice %41 {offsets = [16, 0], sizes = [64, 32], strides = [1, 1]} : vector<96x32xf32> to vector<64x32xf32>
    %101 = arith.truncf %100 : vector<64x32xf32> to vector<64x32xbf16>
    %c4 = arith.constant 4 : index
    %c0_36 = arith.constant 0 : index
    %c0_37 = arith.constant 0 : index
    %102 = vector.load %arg4[%c4, %c0_36, %c0_37] : memref<9x32x32xbf16, #tpu.memory_space<vmem>>, vector<1x32x32xbf16>
    %103 = vector.shape_cast %102 : vector<1x32x32xbf16> to vector<32x32xbf16>
    %cst_38 = arith.constant dense<0.000000e+00> : vector<64x32xf32>
    %104 = tpu.matmul %101, %103, %cst_38 {dimension_numbers = #tpu.dot_dimension_numbers<[1], [0], [0], [1], [0, 0, 1, 1], [], []>} : vector<64x32xbf16>, vector<32x32xbf16>, vector<64x32xf32> -> vector<64x32xf32>
    %105 = arith.addf %99, %104 : vector<64x32xf32>
    %106 = vector.extract_strided_slice %41 {offsets = [17, 0], sizes = [64, 32], strides = [1, 1]} : vector<96x32xf32> to vector<64x32xf32>
    %cst_39 = arith.constant 0.000000e+00 : f32
    %107 = vector.shape_cast %62 : vector<64x1xi1> to vector<64x1xi1>
    %108 = vector.broadcast %107 : vector<64x1xi1> to vector<64x32xi1>
    %109 = vector.broadcast %cst_39 : f32 to vector<64x32xf32>
    %110 = arith.select %108, %106, %109 : vector<64x32xi1>, vector<64x32xf32>
    %111 = arith.truncf %110 : vector<64x32xf32> to vector<64x32xbf16>
    %c5 = arith.constant 5 : index
    %c0_40 = arith.constant 0 : index
    %c0_41 = arith.constant 0 : index
    %112 = vector.load %arg4[%c5, %c0_40, %c0_41] : memref<9x32x32xbf16, #tpu.memory_space<vmem>>, vector<1x32x32xbf16>
    %113 = vector.shape_cast %112 : vector<1x32x32xbf16> to vector<32x32xbf16>
    %cst_42 = arith.constant dense<0.000000e+00> : vector<64x32xf32>
    %114 = tpu.matmul %111, %113, %cst_42 {dimension_numbers = #tpu.dot_dimension_numbers<[1], [0], [0], [1], [0, 0, 1, 1], [], []>} : vector<64x32xbf16>, vector<32x32xbf16>, vector<64x32xf32> -> vector<64x32xf32>
    %115 = arith.addf %105, %114 : vector<64x32xf32>
    %116 = vector.extract_strided_slice %41 {offsets = [23, 0], sizes = [64, 32], strides = [1, 1]} : vector<96x32xf32> to vector<64x32xf32>
    %cst_43 = arith.constant 0.000000e+00 : f32
    %117 = vector.shape_cast %60 : vector<64x1xi1> to vector<64x1xi1>
    %118 = vector.broadcast %117 : vector<64x1xi1> to vector<64x32xi1>
    %119 = vector.broadcast %cst_43 : f32 to vector<64x32xf32>
    %120 = arith.select %118, %116, %119 : vector<64x32xi1>, vector<64x32xf32>
    %121 = arith.truncf %120 : vector<64x32xf32> to vector<64x32xbf16>
    %c6 = arith.constant 6 : index
    %c0_44 = arith.constant 0 : index
    %c0_45 = arith.constant 0 : index
    %122 = vector.load %arg4[%c6, %c0_44, %c0_45] : memref<9x32x32xbf16, #tpu.memory_space<vmem>>, vector<1x32x32xbf16>
    %123 = vector.shape_cast %122 : vector<1x32x32xbf16> to vector<32x32xbf16>
    %cst_46 = arith.constant dense<0.000000e+00> : vector<64x32xf32>
    %124 = tpu.matmul %121, %123, %cst_46 {dimension_numbers = #tpu.dot_dimension_numbers<[1], [0], [0], [1], [0, 0, 1, 1], [], []>} : vector<64x32xbf16>, vector<32x32xbf16>, vector<64x32xf32> -> vector<64x32xf32>
    %125 = arith.addf %115, %124 : vector<64x32xf32>
    %126 = vector.extract_strided_slice %41 {offsets = [24, 0], sizes = [64, 32], strides = [1, 1]} : vector<96x32xf32> to vector<64x32xf32>
    %127 = arith.truncf %126 : vector<64x32xf32> to vector<64x32xbf16>
    %c7 = arith.constant 7 : index
    %c0_47 = arith.constant 0 : index
    %c0_48 = arith.constant 0 : index
    %128 = vector.load %arg4[%c7, %c0_47, %c0_48] : memref<9x32x32xbf16, #tpu.memory_space<vmem>>, vector<1x32x32xbf16>
    %129 = vector.shape_cast %128 : vector<1x32x32xbf16> to vector<32x32xbf16>
    %cst_49 = arith.constant dense<0.000000e+00> : vector<64x32xf32>
    %130 = tpu.matmul %127, %129, %cst_49 {dimension_numbers = #tpu.dot_dimension_numbers<[1], [0], [0], [1], [0, 0, 1, 1], [], []>} : vector<64x32xbf16>, vector<32x32xbf16>, vector<64x32xf32> -> vector<64x32xf32>
    %131 = arith.addf %125, %130 : vector<64x32xf32>
    %132 = vector.extract_strided_slice %41 {offsets = [25, 0], sizes = [64, 32], strides = [1, 1]} : vector<96x32xf32> to vector<64x32xf32>
    %cst_50 = arith.constant 0.000000e+00 : f32
    %133 = vector.shape_cast %62 : vector<64x1xi1> to vector<64x1xi1>
    %134 = vector.broadcast %133 : vector<64x1xi1> to vector<64x32xi1>
    %135 = vector.broadcast %cst_50 : f32 to vector<64x32xf32>
    %136 = arith.select %134, %132, %135 : vector<64x32xi1>, vector<64x32xf32>
    %137 = arith.truncf %136 : vector<64x32xf32> to vector<64x32xbf16>
    %c8 = arith.constant 8 : index
    %c0_51 = arith.constant 0 : index
    %c0_52 = arith.constant 0 : index
    %138 = vector.load %arg4[%c8, %c0_51, %c0_52] : memref<9x32x32xbf16, #tpu.memory_space<vmem>>, vector<1x32x32xbf16>
    %139 = vector.shape_cast %138 : vector<1x32x32xbf16> to vector<32x32xbf16>
    %cst_53 = arith.constant dense<0.000000e+00> : vector<64x32xf32>
    %140 = tpu.matmul %137, %139, %cst_53 {dimension_numbers = #tpu.dot_dimension_numbers<[1], [0], [0], [1], [0, 0, 1, 1], [], []>} : vector<64x32xbf16>, vector<32x32xbf16>, vector<64x32xf32> -> vector<64x32xf32>
    %141 = arith.addf %131, %140 : vector<64x32xf32>
    %142 = vector.broadcast %5 : vector<1x32xf32> to vector<64x32xf32>
    %143 = arith.mulf %141, %142 : vector<64x32xf32>
    %144 = vector.broadcast %6 : vector<1x32xf32> to vector<64x32xf32>
    %145 = arith.addf %143, %144 : vector<64x32xf32>
    %cst_54 = arith.constant 0.000000e+00 : f32
    %146 = vector.broadcast %cst_54 : f32 to vector<64x32xf32>
    %147 = arith.maximumf %145, %146 : vector<64x32xf32>
    %148 = arith.truncf %147 : vector<64x32xf32> to vector<64x32xbf16>
    %c0_55 = arith.constant 0 : index
    %c0_56 = arith.constant 0 : index
    %149 = vector.load %arg6[%c0_55, %c0_56] : memref<32x128xbf16, #tpu.memory_space<vmem>>, vector<32x128xbf16>
    %cst_57 = arith.constant dense<0.000000e+00> : vector<64x128xf32>
    %150 = tpu.matmul %148, %149, %cst_57 {dimension_numbers = #tpu.dot_dimension_numbers<[1], [0], [0], [1], [0, 0, 1, 1], [], []>} : vector<64x32xbf16>, vector<32x128xbf16>, vector<64x128xf32> -> vector<64x128xf32>
    %151 = vector.broadcast %8 : vector<1x128xf32> to vector<64x128xf32>
    %152 = arith.mulf %150, %151 : vector<64x128xf32>
    %153 = vector.broadcast %9 : vector<1x128xf32> to vector<64x128xf32>
    %154 = arith.addf %152, %153 : vector<64x128xf32>
    %cst_58 = arith.constant dense<0.000000e+00> : vector<128xf32>
    %155 = vector.multi_reduction <add>, %154, %cst_58 [0] : vector<64x128xf32> to vector<128xf32>
    %156 = vector.shape_cast %155 : vector<128xf32> to vector<1x128xf32>
    %cst_59 = arith.constant 6.400000e+01 : f32
    %157 = vector.broadcast %cst_59 : f32 to vector<1x128xf32>
    %158 = arith.divf %156, %157 : vector<1x128xf32>
    %159 = arith.truncf %158 : vector<1x128xf32> to vector<1x128xbf16>
    %c0_60 = arith.constant 0 : index
    %c0_61 = arith.constant 0 : index
    %160 = vector.load %arg7[%c0_60, %c0_61] : memref<128x8xbf16, #tpu.memory_space<vmem>>, vector<128x8xbf16>
    %cst_62 = arith.constant dense<0.000000e+00> : vector<1x8xf32>
    %161 = tpu.matmul %159, %160, %cst_62 {dimension_numbers = #tpu.dot_dimension_numbers<[1], [0], [0], [1], [0, 0, 1, 1], [], []>} : vector<1x128xbf16>, vector<128x8xbf16>, vector<1x8xf32> -> vector<1x8xf32>
    %cst_63 = arith.constant 0.000000e+00 : f32
    %162 = vector.broadcast %cst_63 : f32 to vector<1x8xf32>
    %163 = arith.maximumf %161, %162 : vector<1x8xf32>
    %164 = arith.truncf %163 : vector<1x8xf32> to vector<1x8xbf16>
    %c0_64 = arith.constant 0 : index
    %c0_65 = arith.constant 0 : index
    %165 = vector.load %arg8[%c0_64, %c0_65] : memref<8x128xbf16, #tpu.memory_space<vmem>>, vector<8x128xbf16>
    %cst_66 = arith.constant dense<0.000000e+00> : vector<1x128xf32>
    %166 = tpu.matmul %164, %165, %cst_66 {dimension_numbers = #tpu.dot_dimension_numbers<[1], [0], [0], [1], [0, 0, 1, 1], [], []>} : vector<1x8xbf16>, vector<8x128xbf16>, vector<1x128xf32> -> vector<1x128xf32>
    %cst_67 = arith.constant 0.000000e+00 : f32
    %167 = vector.broadcast %cst_67 : f32 to vector<1x128xf32>
    %168 = arith.subf %167, %166 : vector<1x128xf32>
    %169 = math.exp %168 : vector<1x128xf32>
    %cst_68 = arith.constant 1.000000e+00 : f32
    %170 = vector.broadcast %cst_68 : f32 to vector<1x128xf32>
    %171 = arith.addf %170, %169 : vector<1x128xf32>
    %cst_69 = arith.constant 1.000000e+00 : f32
    %172 = vector.broadcast %cst_69 : f32 to vector<1x128xf32>
    %173 = arith.divf %172, %171 : vector<1x128xf32>
    %174 = vector.broadcast %173 : vector<1x128xf32> to vector<64x128xf32>
    %175 = arith.mulf %154, %174 : vector<64x128xf32>
    %176 = arith.addf %175, %11 : vector<64x128xf32>
    %cst_70 = arith.constant 0.000000e+00 : f32
    %177 = vector.broadcast %cst_70 : f32 to vector<64x128xf32>
    %178 = arith.maximumf %176, %177 : vector<64x128xf32>
    %c0_71 = arith.constant 0 : index
    %c0_72 = arith.constant 0 : index
    %c0_73 = arith.constant 0 : index
    %179 = vector.load %arg9[%c0_71, %c0_72, %c0_73] : memref<1x64x128xf32, #tpu.memory_space<vmem>>, vector<1x64x128xf32>
    %180 = vector.shape_cast %179 : vector<1x64x128xf32> to vector<64x128xf32>
    %181 = vector.shape_cast %178 : vector<64x128xf32> to vector<1x64x128xf32>
    tpu.vector_store %arg9[%c0_71, %c0_72, %c0_73], %181 {strides = array<i32>} : memref<1x64x128xf32, #tpu.memory_space<vmem>>, vector<1x64x128xf32>,
    return
  }
  func.func @transform_0(%arg0: i32) -> (i32, i32, i32) {
    %c0_i32 = arith.constant 0 : i32
    %c0_i32_0 = arith.constant 0 : i32
    %c0_i32_1 = arith.constant 0 : i32
    return %arg0, %c0_i32, %c0_i32_0 : i32, i32, i32
  }
  func.func @transform_1(%arg0: i32) -> (i32, i32) {
    %c0_i32 = arith.constant 0 : i32
    %c0_i32_0 = arith.constant 0 : i32
    %c0_i32_1 = arith.constant 0 : i32
    return %c0_i32, %c0_i32_0 : i32, i32
  }
  func.func @transform_2(%arg0: i32) -> (i32, i32) {
    %c0_i32 = arith.constant 0 : i32
    %c0_i32_0 = arith.constant 0 : i32
    %c0_i32_1 = arith.constant 0 : i32
    return %c0_i32, %c0_i32_0 : i32, i32
  }
  func.func @transform_3(%arg0: i32) -> (i32, i32, i32) {
    %c0_i32 = arith.constant 0 : i32
    %c0_i32_0 = arith.constant 0 : i32
    %c0_i32_1 = arith.constant 0 : i32
    %c0_i32_2 = arith.constant 0 : i32
    return %c0_i32, %c0_i32_0, %c0_i32_1 : i32, i32, i32
  }
  func.func @transform_4(%arg0: i32) -> (i32, i32) {
    %c0_i32 = arith.constant 0 : i32
    %c0_i32_0 = arith.constant 0 : i32
    %c0_i32_1 = arith.constant 0 : i32
    return %c0_i32, %c0_i32_0 : i32, i32
  }
  func.func @transform_5(%arg0: i32) -> (i32, i32) {
    %c0_i32 = arith.constant 0 : i32
    %c0_i32_0 = arith.constant 0 : i32
    %c0_i32_1 = arith.constant 0 : i32
    return %c0_i32, %c0_i32_0 : i32, i32
  }
  func.func @transform_6(%arg0: i32) -> (i32, i32) {
    %c0_i32 = arith.constant 0 : i32
    %c0_i32_0 = arith.constant 0 : i32
    %c0_i32_1 = arith.constant 0 : i32
    return %c0_i32, %c0_i32_0 : i32, i32
  }
  func.func @transform_7(%arg0: i32) -> (i32, i32) {
    %c0_i32 = arith.constant 0 : i32
    %c0_i32_0 = arith.constant 0 : i32
    %c0_i32_1 = arith.constant 0 : i32
    return %c0_i32, %c0_i32_0 : i32, i32
  }
  func.func @transform_8(%arg0: i32) -> (i32, i32, i32) {
    %c0_i32 = arith.constant 0 : i32
    %c0_i32_0 = arith.constant 0 : i32
    %c0_i32_1 = arith.constant 0 : i32
    return %arg0, %c0_i32, %c0_i32_0 : i32, i32, i32
  }
}

</mosaic_0001>

<bundles_post_ra>
// kernel: se_bottleneck_ibn_forward.1
= control target key start
LH: loop header
LB: loop body
LE: loop exit
PB: predicated region body
PF: predicated region fallthrough
CT: control target
= control target key end

     0   :  { %13 = vsyncpa [#allocation3], 0  ;;  %s3597_s0 = inlined_call_operand.vmem [shape: f32[2,64,128], index: 0, kind: input, shape index: {}]   ;;  %s3598_s1 = inlined_call_operand.vmem [shape: bf16[128,32], index: 1, kind: input, shape index: {}]   ;;  %s3599_s2 = inlined_call_operand.vmem [shape: f32[6,32], index: 2, kind: input, shape index: {}]   ;;  %s3600_s3 = inlined_call_operand.vmem [shape: bf16[9,32,32], index: 3, kind: input, shape index: {}]   ;;  %s3601_s4 = inlined_call_operand.vmem [shape: f32[2,128], index: 4, kind: input, shape index: {}]   ;;  %s3602_s5 = inlined_call_operand.vmem [shape: bf16[32,128], index: 5, kind: input, shape index: {}]   ;;  %s3603_s6 = inlined_call_operand.vmem [shape: bf16[128,8], index: 6, kind: input, shape index: {}]   ;;  %s3604_s7 = inlined_call_operand.vmem [shape: bf16[8,128], index: 7, kind: input, shape index: {}]   ;;  %s3605_s8 = inlined_call_operand.hbm [shape: f32[2,64,128], index: 8, kind: output, shape index: {}]  }
   0x1   :  { %15 = vsyncpa [#allocation3 + $0x1], 0  ;;  %s2838_s27 = smov 0   ;;  %s2840_s28 = smov 0  }
   0x2   :  { %s2842_s29 = smov 0   ;;  %s2844_s30 = smov 0  }
   0x3 LB: > { %s2859_s9 = sadd.s32 4294967295, %s2786_s30   ;;  %s2191_s10 = sadd.s32 4294967294, %s2786_s30   ;;  %s2786_s30 = sphi %s2844_s30, %s3664_s30   ;;  %s2782_s29 = sphi %s2842_s29, %s3663_s29   ;;  %s2778_s28 = sphi %s2840_s28, %s3662_s28   ;;  %s2774_s27 = sphi %s2838_s27, %s3661_s27  }
   0x4   : > { %s2863_s11 = sadd.s32 1, %s2786_s30   ;;  %s201_s12 = sadd.s32 1, %s2782_s29 }
   0x5   : > { %s198_s13 = ssub.s32 %s2786_s30, %s2863_s11  ;;  %p211_p0 = scmp.ne.s32.totalorder %s2782_s29, %s2778_s28 }
   0x6   : > { %p199_p1 = scmp.eq.s32.totalorder %s198_s13, 0  ;;  %p212_p2 = scmp.eq.s32.totalorder %s2859_s9, 1 }
   0x7   : > { %p217_p3 = scmp.ne.s32.totalorder %s2778_s28, %s2774_s27  ;;  %p218_p4 = scmp.eq.s32.totalorder %s2191_s10, 1 }
   0x8   : > { %s2874_s14 = scalar_select %p199_p1, %s2782_s29, %s201_s12  }
   0x9   : > { %p2876_p5 = por %p212_p2, %p211_p0  ;;  %p2880_p6 = por %p218_p4, %p217_p3 }
   0xa   : > { %p2194_p7 = scmp.ge.s32.totalorder %s2786_s30, 1  ;;  %p265_p8 = scmp.lt.s32.totalorder %s2786_s30, 3 }
   0xc   : > { %p266_p9 = pnand %p2194_p7, %p265_p8 }
   0xd   : > { %v2674_v0 = vld [vmem:[%s3598_s1] sm:$0xff] (!%p266_p9)   ;;  %p299_p10 = scmp.lt.s32.totalorder (!%p266_p9), %s2859_s9, 1  ;;  %v2675_v1 = vld [vmem:[%s3598_s1 + $0x8] sm:$0xff] (!%p266_p9)   ;;  %v2676_v2 = vld [vmem:[%s3598_s1 + $0x10] sm:$0xff] (!%p266_p9)   ;;  %vm448_vm0 = vcmask (!%p266_p9), 261120   ;;  %vm3607_vm4 = vcmask (!%p266_p9), 1046528  }
   0xe   : > { %269 = sbr.rel (%p266_p9) target bundleno = 1414 (0x586), region = 52  ;;  %2397 = vmatprep.subr.bf16.mxu0 (!%p266_p9), %v2674_v0  ;;  %v2677_v3 = vld [vmem:[%s3598_s1 + $0x18] sm:$0xff] (!%p266_p9)   ;;  %v2678_v7 = vld [vmem:[%s3598_s1 + $0x20] sm:$0xff] (!%p266_p9)   ;;  %v2679_v8 = vld [vmem:[%s3598_s1 + $0x28] sm:$0xff] (!%p266_p9)   ;;  %s296_s12 = sand.u32 (!%p266_p9), 1, %s2778_s28  }
   0xf   : > { %2398 = vmatpush3.bf16.msra.mxu0 (!%p266_p9), %v2674_v0  ;;  %v2680_v9 = vld [vmem:[%s3598_s1 + $0x30] sm:$0xff] (!%p266_p9)   ;;  %v2681_v10 = vld [vmem:[%s3598_s1 + $0x38] sm:$0xff] (!%p266_p9)   ;;  %v2683_v21 = vld [vmem:[%s3600_s3 + $0x20] sm:$0xff] (!%p266_p9)   ;;  %s2195_s13 = sshll.u32 (!%p266_p9), %s296_s12, 6  ;;  %s2313_s17 = sshll.u32 (!%p266_p9), %s2859_s9, 10 }
  0x10   : > { %2399 = vmatprep.subr.bf16.mxu0 (!%p266_p9), %v2675_v1  ;;  %v2682_v20 = vld [vmem:[%s3600_s3 + $0x10] sm:$0xff] (!%p266_p9)   ;;  %v2684_v22 = vld [vmem:[%s3600_s3 + $0x18] sm:$0xff] (!%p266_p9)   ;;  %2445 = vmatprep.subr.bf16.mxu1 (!%p266_p9), %v2683_v21  ;;  %v2685_v23 = vld [vmem:[%s3600_s3 + $0x28] sm:$0xff] (!%p266_p9)   ;;  %s3528_s18 = scalar_lea.vmem (!%p266_p9), [#allocation2], %s2195_s13  ;;  %s2790_s23 = smov (!%p266_p9), [#allocation2]  }
  0x11   : > { %2446 = vmatpush3.bf16.msra.mxu1 (!%p266_p9), %v2683_v21  ;;  %v2940_v24 = vld [vmem:[%s3600_s3 + $0x30] sm:$0xff] (!%p266_p9)   ;;  %v2946_v25 = vld [vmem:[%s3600_s3] sm:$0xff] (!%p266_p9)   ;;  %s2129_s19 = sshll.u32 (!%p266_p9), %s3528_s18, 4  ;;  %s3544_s19 = int_to_ptr.vmem [resolvable:$true] %s2129_s19 }
  0x12   : > { %2447 = vmatprep.subr.bf16.mxu1 (!%p266_p9), %v2685_v23  ;;  %s2724_s22 = scalar_lea.vmem (!%p266_p9), %s3544_s19, 1024 }
  0x13   : > { %2400 = vmatpush3.bf16.msra.mxu0 (!%p266_p9), %v2675_v1  ;;  %p2725_p11 = scmp.ne.s32.totalorder (!%p266_p9), %s3544_s19, %s2724_s22 }
  0x14   : > { %2401 = vmatprep.subr.bf16.mxu0 (!%p266_p9), %v2676_v2 }
  0x15   : > { %s300_s21 = scalar_select %p299_p10, %s2859_s9, 1  ;;  %2448 = vmatpush3.bf16.msra.mxu1 %v2685_v23 }
  0x16   : > { %2457 = vmatprep.subr.bf16.mxu1 %v2940_v24  ;;  %p2726_p12 = pnand %p2725_p11, %p2876_p5 }
  0x17   : > { %s2312_s24 = sshll.u32 %s300_s21, 6  ;;  %2402 = vmatpush3.bf16.msra.mxu0 %v2676_v2  ;;  %s3542_s21 = scalar_lea.hbm %s3605_s8, %s2313_s17 }
  0x18   : > { %s2900_s10 = scalar_lea.vmem %s3597_s0, %s2312_s24  ;;  %2403 = vmatprep.subr.bf16.mxu0 %v2677_v3  ;;  %p2727_p13 = pneg %p2726_p12 }
  0x19   : > { %v307_v4 = vld [vmem:[%s2900_s10] sm:$0xff]  ;;  %v308_v5 = vld [vmem:[%s2900_s10 + $0x8] sm:$0xff]  ;;  %v309_v11 = vld [vmem:[%s2900_s10 + $0x10] sm:$0xff]  ;;  %s2728_s24 = sshll.u32 %s2790_s23, 4  ;;  %s2729_s24 = int_to_ptr.vmem [resolvable:$false] %s2728_s24 }
  0x1a   : > { %v315_v6 = vpack.c.bf16 %v308_v5, %v307_v4  ;;  %v310_v12 = vld [vmem:[%s2900_s10 + $0x18] sm:$0xff]  ;;  %v311_v13 = vld [vmem:[%s2900_s10 + $0x20] sm:$0xff]  ;;  %v312_v14 = vld [vmem:[%s2900_s10 + $0x28] sm:$0xff]  ;;  %s2730_s25 = scalar_lea.vmem %s2729_s24, 2048  ;;  %p2731_p0 = scmp.lt.s32.totalorder %s3544_s19, %s2729_s24 }
  0x1b   : > { %2404 = vmatpush3.bf16.msra.mxu0 %v2677_v3  ;;  %v316_v15 = vpack.c.bf16 %v310_v12, %v309_v11  ;;  %v317_v16 = vpack.c.bf16 %v312_v14, %v311_v13  ;;  %v313_v17 = vld [vmem:[%s2900_s10 + $0x30] sm:$0xff]  ;;  %v314_v18 = vld [vmem:[%s2900_s10 + $0x38] sm:$0xff]  ;;  %p2732_p1 = scmp.lt.s32.totalorder %s2730_s25, %s2724_s22 }
  0x1c   : > { %2413 = vmatprep.mubr.bf16.mxu0 %v315_v6  ;;  %2405 = vmatprep.subr.bf16.mxu0 %v2678_v7  ;;  %v318_v19 = vpack.c.bf16 %v314_v18, %v313_v17 }
  0x1d   : > { %p2733_p2 = por %p2732_p1, %p2731_p0 }
  0x1f   : > { %2406 = vmatpush3.bf16.msra.mxu0 %v2678_v7  ;;  %p2734_p3 = pnand %p2733_p2, %p2727_p13 }
  0x20   : > { %2407 = vmatprep.subr.bf16.mxu0 %v2679_v8 }
  0x23   : > { %2408 = vmatpush3.bf16.msra.mxu0 %v2679_v8 }
  0x24   : > { %2409 = vmatprep.subr.bf16.mxu0 %v2680_v9 }
  0x27   : > { %2410 = vmatpush3.bf16.msra.mxu0 %v2680_v9 }
  0x28   : > { %2411 = vmatprep.subr.bf16.mxu0 %v2681_v10 }
  0x2b   : > { %2412 = vmatpush3.bf16.msra.mxu0 %v2681_v10 }
  0x2c   : > { %2421 = vmatprep.subr.bf16.mxu0 %v2682_v20 }
  0x2e   : > { %2414 = vmatmul.mubr.bf16.vlgmr.msra.gmra.mrb[0].mxu0 %v316_v15 }
  0x2f   : > { %2417 = vmatprep.mubr.bf16.mxu0 %v317_v16  ;;  %2422 = vmatpush3.bf16.msra.mxu0 %v2682_v20 }
  0x30   : > { %2423 = vmatprep.subr.bf16.mxu0 %v2684_v22 }
  0x33   : > { %2424 = vmatpush3.bf16.msra.mxu0 %v2684_v22 }
  0x34   : > { %2433 = vmatprep.subr.bf16.mxu0 %v2946_v25 }
  0x36   : > { %2418 = vmatmul.mubr.bf16.gmra.mrb[4].mxu0 %v318_v19 }
 0x101   : > { %v2949_v26 = vpop.f32.mrb[0].mxu0 }
 0x102   : > { %v2951_v27 = vpop.f32.mrb[1].mxu0  ;;  %v452_v33 = vsel %vm448_vm0, %v2949_v26, 0.0 }
 0x103   : > { %v2953_v28 = vpop.f32.mrb[2].mxu0  ;;  %v449_v30 = vsel %vm448_vm0, %v2951_v27, 0.0 }
 0x104   : > { %v2955_v29 = vpop.f32.mrb[3].mxu0  ;;  %v454_v35 = vsel %vm448_vm0, %v2953_v28, 0.0 }
 0x105   : > { %v450_v31 = vsel %vm448_vm0, %v2955_v29, 0.0 }
 0x106   : > { %v451_v32 = vadd.f32 %v450_v31, %v449_v30 }
 0x108   : > { %v453_v34 = vadd.f32 %v452_v33, %v451_v32 }
 0x109   : > { %v2965_v36 = vpop.f32.mrb[4].mxu0 }
 0x10a   : > { %v2967_v37 = vpop.f32.mrb[5].mxu0  ;;  %v455_v38 = vadd.f32 %v454_v35, %v453_v34  ;;  %v460_v45 = vsel %vm448_vm0, %v2965_v36, 0.0 }
 0x10b   : > { %v456_v39 = vsel %vm448_vm0, %v2967_v37, 0.0  ;;  %v2971_v40 = vpop.f32.mrb[6].mxu0 }
 0x10c   : > { %v457_v41 = vadd.f32 %v456_v39, %v455_v38  ;;  %v2973_v42 = vpop.f32.mrb[7].mxu0  ;;  %v462_v47 = vsel %vm448_vm0, %v2971_v40, 0.0  ;;  %v523_v39 = vlaneseq }
 0x10d   : > { %v458_v43 = vsel %vm448_vm0, %v2973_v42, 0.0 }
 0x10e   : > { %v459_v44 = vadd.f32 %v458_v43, %v457_v41  ;;  %v3000_v41 = vld [vmem:[%s3599_s2] sm:$0x3f]  ;;  %v3002_v43 = vshrl.u32 %v523_v39, 7 }
 0x110   : > { %v461_v46 = vadd.f32 %v460_v45, %v459_v44  ;;  %v514_v44 = vrot.slane %v3000_v41, 2 }
 0x112   : > { %v463_v48 = vadd.f32 %v462_v47, %v461_v46  ;;  %v3007_v47 = vsub.s32 0, %v3002_v43 }
 0x114   : > { %v464_v49 = vrot.slane %v463_v48, 4 }
 0x116   : > { %v465_v50 = vadd.f32 %v464_v49, %v463_v48  ;;  %v557_v48 = vadd.s32 8, %v3002_v43  ;;  %v3011_v49 = vadd.s32 16, %v3002_v43 }
 0x118   : > { %v466_v51 = vrot.slane %v465_v50, 2 }
 0x11a   : > { %v467_v52 = vadd.f32 %v466_v51, %v465_v50  ;;  %v3014_v50 = vadd.s32 24, %v3002_v43 }
 0x11c   : > { %v468_v53 = vrot.slane %v467_v52, 1 }
 0x11e   : > { %v469_v54 = vadd.f32 %v468_v53, %v467_v52  ;;  %v3609_v53 = vsub.s32 1, %v3002_v43 }
 0x120   : > { %v471_v55 = vmul.f32 0.015625, %v469_v54  ;;  %v568_v54 = vand.u32 7, %v3002_v43 }
 0x122   : > { %v472_v56 = vsub.f32 %v2951_v27, %v471_v55  ;;  %v473_v57 = vsub.f32 %v2955_v29, %v471_v55  ;;  %v474_v58 = vsub.f32 %v2949_v26, %v471_v55  ;;  %v475_v59 = vsub.f32 %v2953_v28, %v471_v55 }
 0x123   : > { %v476_v60 = vsub.f32 %v2967_v37, %v471_v55  ;;  %v477_v61 = vsub.f32 %v2973_v42, %v471_v55  ;;  %v478_v62 = vsub.f32 %v2965_v36, %v471_v55  ;;  %v479_v63 = vsub.f32 %v2971_v40, %v471_v55 }
 0x124   : > { %v480_v0 = vmul.f32 %v472_v56, %v472_v56  ;;  %v481_v1 = vmul.f32 %v473_v57, %v473_v57  ;;  %v482_v2 = vmul.f32 %v474_v58, %v474_v58  ;;  %v483_v3 = vmul.f32 %v475_v59, %v475_v59 }
 0x125   : > { %v484_v7 = vmul.f32 %v476_v60, %v476_v60  ;;  %v485_v10 = vmul.f32 %v477_v61, %v477_v61  ;;  %v486_v13 = vmul.f32 %v478_v62, %v478_v62  ;;  %v487_v16 = vmul.f32 %v479_v63, %v479_v63 }
 0x126   : > { %v488_v4 = vsel %vm448_vm0, %v480_v0, 0.0  ;;  %v489_v5 = vsel %vm448_vm0, %v481_v1, 0.0  ;;  %v491_v8 = vsel %vm448_vm0, %v482_v2, 0.0  ;;  %v493_v11 = vsel %vm448_vm0, %v483_v3, 0.0 }
 0x127   : > { %v490_v6 = vadd.f32 %v489_v5, %v488_v4  ;;  %v495_v14 = vsel %vm448_vm0, %v484_v7, 0.0  ;;  %v497_v17 = vsel %vm448_vm0, %v485_v10, 0.0  ;;  %v499_v19 = vsel %vm448_vm0, %v486_v13, 0.0 }
 0x128   : > { %v501_v21 = vsel %vm448_vm0, %v487_v16, 0.0  ;;  %v3019_v56 = vadd.s32 32, %v3002_v43  ;;  %v3022_v57 = vadd.s32 40, %v3002_v43  ;;  %v575_v60 = vand.u32 7, %v557_v48 }
 0x129   : > { %v492_v9 = vadd.f32 %v491_v8, %v490_v6  ;;  %v582_v61 = vand.u32 7, %v3011_v49  ;;  %v589_v62 = vand.u32 7, %v3014_v50  ;;  %v3610_v63 = vmov 0.0  }
 0x12a   : > { %v3031_v0 = vadd.s32 48, %v3002_v43  ;;  %v3034_v1 = vadd.s32 56, %v3002_v43  ;;  %vm3044_vm1 = vcmp.gt.s32.totalorder %v568_v54, 0  ;;  %vm3056_vm2 = vcmp.lt.s32.totalorder %v568_v54, 7 }
 0x12b   : > { %v494_v12 = vadd.f32 %v493_v11, %v492_v9  ;;  %vm3060_vm3 = vcmp.lt.s32.totalorder %v575_v60, 7  ;;  %vm3066_vm5 = vcmp.lt.s32.totalorder %v582_v61, 7  ;;  %vm3072_vm6 = vcmp.lt.s32.totalorder %v589_v62, 7 }
 0x12c   : > { %vm3101_vm10 = vcmp.gt.s32.totalorder %v575_v60, 0  ;;  %vm3161_vm13 = vcmp.gt.s32.totalorder %v582_v61, 0  ;;  %vm3167_vm14 = vcmp.gt.s32.totalorder %v589_v62, 0 }
 0x12d   : > { %v496_v15 = vadd.f32 %v495_v14, %v494_v12  ;;  %v610_v14 = vand.u32 7, %v3031_v0 }
 0x12f   : > { %v498_v18 = vadd.f32 %v497_v17, %v496_v15  ;;  %v617_v15 = vand.u32 7, %v3034_v1  ;;  %vm3123_vm11 = vcmp.lt.s32.totalorder %v610_v14, 7 }
 0x131   : > { %v500_v20 = vadd.f32 %v499_v19, %v498_v18  ;;  %vm3147_vm12 = vcmp.lt.s32.totalorder %v617_v15, 7 }
 0x133   : > { %v502_v22 = vadd.f32 %v501_v21, %v500_v20 }
 0x135   : > { %v503_v23 = vrot.slane %v502_v22, 4 }
 0x137   : > { %v504_v30 = vadd.f32 %v503_v23, %v502_v22  ;;  %v2693_v22 = vld [vmem:[%s3600_s3 + $0x58] sm:$0xff]   ;;  %v2694_v23 = vld [vmem:[%s3600_s3 + $0x60] sm:$0xff]  }
 0x139   : > { %v505_v31 = vrot.slane %v504_v30, 2 }
 0x13b   : > { %v506_v32 = vadd.f32 %v505_v31, %v504_v30 }
 0x13d   : > { %v507_v33 = vrot.slane %v506_v32, 1 }
 0x13f   : > { %v508_v34 = vadd.f32 %v507_v33, %v506_v32 }
 0x141   : > { %v509_v35 = vmul.f32 0.015625, %v508_v34 }
 0x143   : > { %v510_v38 = vadd.f32 1e-05, %v509_v35 }
 0x145   : > { %2710 = vrsqrt.f32 %v510_v38 }
 0x14f   : > { %v2711_v45 = vpop.eup %2710 }
 0x150   : > { %v512_v46 = vmul.f32 %v2711_v45, %v3000_v41 }
 0x152   : > { %v516_v51 = vadd.f32 %v514_v44, %v512_v46  ;;  %v517_v52 = vmul.f32 %v512_v46, %v471_v55  ;;  %v3028_v55 = vrot.slane %v3610_v63, 7 }
 0x154   : > { %v519_v58 = vrot.slane %v517_v52, 7  ;;  %v526_v59 = vrot.slane %v516_v51, %v3007_v47  ;;  %v725_v13 = vsel %vm3044_vm1, %v3028_v55, 0.0 }
 0x156   : > { %v521_v2 = vsub.f32 %v3000_v41, %v519_v58  ;;  %v532_v3 = vmul.f32 %v526_v59, %v2973_v42  ;;  %v527_v4 = vmul.f32 %v526_v59, %v2951_v27  ;;  %v528_v5 = vmul.f32 %v526_v59, %v2955_v29  ;;  %v2695_v58 = vld [vmem:[%s3600_s3 + $0x68] sm:$0xff]  }
 0x157   : > { %v529_v6 = vmul.f32 %v2949_v26, %v526_v59  ;;  %v530_v7 = vmul.f32 %v2953_v28, %v526_v59  ;;  %v531_v8 = vmul.f32 %v526_v59, %v2967_v37  ;;  %v533_v9 = vmul.f32 %v2965_v36, %v526_v59 }
 0x158   : > { %v522_v10 = vadd.f32 %v521_v2, %v514_v44  ;;  %v534_v12 = vmul.f32 %v2971_v40, %v526_v59  ;;  %v3050_v42 = vrot.slane %v3610_v63, 1  ;;  %v596_v27 = vand.u32 7, %v3019_v56 }
 0x159   : > { %v603_v26 = vand.u32 7, %v3022_v57 }
 0x15a   : > { %v538_v28 = vrot.slane %v522_v10, %v3609_v53  ;;  %vm3083_vm8 = vcmp.lt.s32.totalorder %v596_v27, 7  ;;  %vm3195_vm15 = vcmp.gt.s32.totalorder %v596_v27, 0 }
 0x15b   : > { %vm3089_vm9 = vcmp.lt.s32.totalorder %v603_v26, 7  ;;  %vm3201_vm7 = vcmp.gt.s32.totalorder %v603_v26, 0 }
 0x15c   : > { %v544_v16 = vadd.f32 %v538_v28, %v532_v3  ;;  %v539_v17 = vadd.f32 %v538_v28, %v527_v4  ;;  %v540_v18 = vadd.f32 %v538_v28, %v528_v5  ;;  %v541_v19 = vadd.f32 %v538_v28, %v529_v6  ;;  %v2689_v4 = vld [vmem:[%s3600_s3 + $0x8] sm:$0xff]  }
 0x15d   : > { %v542_v20 = vadd.f32 %v538_v28, %v530_v7  ;;  %v543_v21 = vadd.f32 %v538_v28, %v531_v8  ;;  %v545_v30 = vadd.f32 %v538_v28, %v533_v9  ;;  %v546_v31 = vadd.f32 %v538_v28, %v534_v12 }
 0x15e   : > { %v3093_v32 = vmax.f32 %v544_v16, 0.0  ;;  %v3095_v33 = vmax.f32 %v539_v17, 0.0  ;;  %v3097_v34 = vmax.f32 %v540_v18, 0.0  ;;  %v3099_v35 = vmax.f32 %v541_v19, 0.0 }
 0x15f   : > { %v3105_v39 = vmax.f32 %v542_v20, 0.0  ;;  %v3107_v44 = vmax.f32 %v543_v21, 0.0  ;;  %v3109_v45 = vmax.f32 %v545_v30, 0.0  ;;  %v3111_v46 = vmax.f32 %v546_v31, 0.0 }
 0x160   : > { %v713_v48 = vrot.slane %v3093_v32, 7  ;;  %v957_v51 = vrot.slane %v3093_v32, 1  ;;  %v741_v52 = vpack.c.bf16 %v3095_v33, %v3610_v63  ;;  %v3119_v54 = vpack.c.bf16 %v3099_v35, %v3097_v34 }
 0x161   : > { %v3129_v59 = vpack.c.bf16 %v3107_v44, %v3105_v39  ;;  %v947_v60 = vrot.slane %v3095_v33, 1  ;;  %v949_v2 = vrot.slane %v3097_v34, 1  ;;  %v951_v3 = vrot.slane %v3099_v35, 1 }
 0x162   : > { %2425 = vmatprep.mubr.msk.bf16.mxu0 %vm448_vm0, %v741_v52  ;;  %v953_v5 = vrot.slane %v3105_v39, 1  ;;  %v955_v6 = vrot.slane %v3107_v44, 1  ;;  %v3142_v7 = vpack.c.bf16 %v3109_v45, %v3093_v32  ;;  %v703_v8 = vrot.slane %v3095_v33, 7 }
 0x163   : > { %2426 = vmatmul.mubr.msk.bf16.vlgmr.msra.gmra.mrb[8].mxu0 %vm448_vm0, %v3119_v54  ;;  %v948_v10 = vsel %vm3607_vm4, %v3050_v42, %v947_v60  ;;  %v950_v12 = vsel %vm3607_vm4, %v947_v60, %v949_v2  ;;  %v3157_v28 = vsel %vm3607_vm4, %v949_v2, %v951_v3  ;;  %v959_v18 = vrot.slane %v3109_v45, 1 }
 0x164   : > { %2429 = vmatprep.mubr.msk.bf16.mxu0 %vm448_vm0, %v3129_v59  ;;  %v3175_v19 = vsel %vm3607_vm4, %v951_v3, %v953_v5  ;;  %v971_v49 = vsel %vm3056_vm2, %v948_v10, 0.0  ;;  %v972_v61 = vsel %vm3060_vm3, %v950_v12, 0.0  ;;  %v1310_v50 = vsel %vm3056_vm2, %v950_v12, 0.0  ;;  %2434 = vmatpush3.bf16.msra.mxu0 %v2946_v25  ;;  %v2692_v25 = vld [vmem:[%s3600_s3 + $0x50] sm:$0xff]  }
 0x165   : > { %v979_v62 = vpack.c.bf16 %v972_v61, %v971_v49  ;;  %v1311_v20 = vsel %vm3060_vm3, %v3157_v28, 0.0  ;;  %v1636_v21 = vsel %vm3056_vm2, %v3157_v28, 0.0  ;;  %v1637_v30 = vsel %vm3060_vm3, %v3175_v19, 0.0  ;;  %2435 = vmatprep.subr.bf16.mxu0 %v2689_v4 }
 0x166   : > { %v3205_v52 = vpack.c.bf16 %v1311_v20, %v1310_v50  ;;  %v973_v60 = vsel %vm3066_vm5, %v3157_v28, 0.0  ;;  %v974_v56 = vsel %vm3072_vm6, %v3175_v19, 0.0  ;;  %v1312_v27 = vsel %vm3066_vm5, %v3175_v19, 0.0  ;;  %v2696_v19 = vld [vmem:[%s3600_s3 + $0x70] sm:$0xff]  }
 0x167   : > { %2449 = vmatprep.mubr.msk.bf16.mxu1 %vm448_vm0, %v979_v62  ;;  %v980_v57 = vpack.c.bf16 %v974_v56, %v973_v60  ;;  %v956_v26 = vsel %vm3607_vm4, %v953_v5, %v955_v6  ;;  %v3219_v2 = vsel %vm3607_vm4, %v955_v6, %v957_v51  ;;  %vm3642_vm3 = vcmask 1040384   ;;  %v2688_v6 = vld [vmem:[%s3600_s3 + $0x38] sm:$0xff]  }
 0x168   : > { %v704_v3 = vsel %vm3642_vm3, %v3028_v55, %v703_v8  ;;  %v975_v10 = vsel %vm3083_vm8, %v956_v26, 0.0  ;;  %v976_v12 = vsel %vm3089_vm9, %v3219_v2, 0.0  ;;  %v1313_v49 = vsel %vm3072_vm6, %v956_v26, 0.0  ;;  %2436 = vmatpush3.bf16.msra.mxu0 %v2689_v4 }
 0x169   : > { %v1638_v5 = vsel %vm3066_vm5, %v956_v26, 0.0  ;;  %vm3239_vm3 = vcmp.gt.s32.totalorder %v610_v14, 0  ;;  %vm3245_vm4 = vcmp.gt.s32.totalorder %v617_v15, 0  ;;  %2450 = vmatmul.mubr.msk.bf16.vlgmr.msra.gmra.mrb[0].mxu1 %vm448_vm0, %v980_v57  ;;  %v981_v37 = vpack.c.bf16 %v976_v12, %v975_v10 }
 0x16a   : > { %v3250_v62 = vpack.c.bf16 %v1313_v49, %v1312_v27  ;;  %v1639_v4 = vsel %vm3072_vm6, %v3219_v2, 0.0  ;;  %v726_v0 = vsel %vm3101_vm10, %v704_v3, 0.0  ;;  %2458 = vmatpush3.bf16.msra.mxu1 %v2940_v24  ;;  %vm3647_vm5 = vcmask 1046528  }
 0x16b   : > { %v3258_v14 = vpack.c.bf16 %v1639_v4, %v1638_v5  ;;  %v733_v1 = vpack.c.bf16 %v726_v0, %v725_v13  ;;  %v3265_v15 = vsel %vm3647_vm5, %v957_v51, %v959_v18  ;;  %v961_v20 = vrot.slane %v3111_v46, 1  ;;  %2453 = vmatprep.mubr.msk.bf16.mxu1 %vm448_vm0, %v981_v37  ;;  %2430 = vmatmul.mubr.msk.bf16.gmra.mrb[12].mxu0 %vm448_vm0, %v3142_v7  ;;  %v3281_v51 = vld [vmem:[%s3600_s3 + $0x40] sm:$0xff]   ;;  %vm3648_vm6 = vmmov %vm3647_vm5 }
 0x16c   : > { %v977_v24 = vsel %vm3123_vm11, %v3265_v15, 0.0  ;;  %v705_v40 = vrot.slane %v3097_v34, 7  ;;  %v707_v60 = vrot.slane %v3099_v35, 7  ;;  %v1088_v13 = vsel %vm3044_vm1, %v704_v3, 0.0  ;;  %2459 = vmatprep.subr.bf16.mxu1 %v2688_v6 }
 0x16d   : > { %2437 = vmatprep.mubr.msk.bf16.mxu0 %vm448_vm0, %v733_v1  ;;  %v3285_v56 = vsel %vm3648_vm6, %v959_v18, %v961_v20  ;;  %v709_v27 = vrot.slane %v3105_v39, 7  ;;  %v711_v57 = vrot.slane %v3107_v44, 7  ;;  %v715_v26 = vrot.slane %v3109_v45, 7 }
 0x16e   : > { %v978_v3 = vsel %vm3147_vm12, %v3285_v56, 0.0  ;;  %vm3649_vm5 = vcmask 1040384   ;;  %v1085_v49 = vrot.slane %v3111_v46, 7  ;;  %2460 = vmatpush3.bf16.msra.mxu1 %v2688_v6  ;;  %v1644_v31 = vpack.c.bf16 %v1637_v30, %v1636_v21  ;;  %v2697_v21 = vld [vmem:[%s3600_s3 + $0x78] sm:$0xff]   ;;  %v2698_v30 = vld [vmem:[%s3600_s3 + $0x80] sm:$0xff]  }
 0x16f   : > { %v706_v10 = vsel %vm3649_vm5, %v703_v8, %v705_v40  ;;  %vm3650_vm2 = vmmov %vm3649_vm5  ;;  %v982_v18 = vpack.c.bf16 %v978_v3, %v977_v24  ;;  %2469 = vmatprep.subr.bf16.mxu1 %v3281_v51  ;;  %v1641_v29 = vsel %vm3089_vm9, %v3285_v56, 0.0  ;;  %v3659_v50 = vmov 0.0  }
 0x170   : > { %v708_v12 = vsel %vm3650_vm2, %v705_v40, %v707_v60  ;;  %v727_v5 = vsel %vm3161_vm13, %v706_v10, 0.0  ;;  %v1089_v4 = vsel %vm3101_vm10, %v706_v10, 0.0  ;;  %vm3651_vm6 = vmmov %vm3650_vm2 }
 0x171   : > { %v728_v37 = vsel %vm3167_vm14, %v708_v12, 0.0  ;;  %v1096_v1 = vpack.c.bf16 %v1089_v4, %v1088_v13  ;;  %v710_v53 = vsel %vm3651_vm6, %v707_v60, %v709_v27  ;;  %vm3652_vm5 = vmmov %vm3650_vm2  ;;  %v1090_v40 = vsel %vm3161_vm13, %v708_v12, 0.0  ;;  %2454 = vmatmul.mubr.msk.bf16.gmra.mrb[4].mxu1 %vm448_vm0, %v982_v18 }
 0x172   : > { %v734_v0 = vpack.c.bf16 %v728_v37, %v727_v5  ;;  %v712_v8 = vsel %vm3652_vm5, %v709_v27, %v711_v57  ;;  %v729_v6 = vsel %vm3195_vm15, %v710_v53, 0.0  ;;  %v1091_v3 = vsel %vm3167_vm14, %v710_v53, 0.0  ;;  %vm3653_vm6 = vmmov %vm3650_vm2 }
 0x173   : > { %v730_v24 = vsel %vm3201_vm7, %v712_v8, 0.0  ;;  %v1097_v60 = vpack.c.bf16 %v1091_v3, %v1090_v40  ;;  %v1428_v27 = vsel %vm3161_vm13, %v710_v53, 0.0  ;;  %v1429_v5 = vsel %vm3167_vm14, %v712_v8, 0.0  ;;  %2461 = vmatprep.mubr.msk.bf16.mxu1 %vm448_vm0, %v1096_v1  ;;  %vm3654_vm13 = vmmov %vm3650_vm2 }
 0x174   : > { %v735_v13 = vpack.c.bf16 %v730_v24, %v729_v6  ;;  %v3321_v37 = vpack.c.bf16 %v1429_v5, %v1428_v27  ;;  %v714_v4 = vsel %vm3650_vm2, %v711_v57, %v713_v48  ;;  %v1092_v63 = vsel %vm3195_vm15, %v712_v8, 0.0  ;;  %2438 = vmatmul.mubr.msk.bf16.vlgmr.msra.gmra.mrb[8].mxu0 %vm448_vm0, %v734_v0  ;;  %vm3656_vm5 = vmmov %vm3650_vm2 }
 0x175   : > { %v716_v18 = vsel %vm3653_vm6, %v713_v48, %v715_v26  ;;  %v1093_v53 = vsel %vm3201_vm7, %v714_v4, 0.0  ;;  %v731_v16 = vsel %vm3239_vm3, %v714_v4, 0.0  ;;  %v1086_v57 = vsel %vm3654_vm13, %v715_v26, %v1085_v49 }
 0x176   : > { %v732_v17 = vsel %vm3245_vm4, %v716_v18, 0.0  ;;  %2441 = vmatprep.mubr.msk.bf16.mxu0 %vm448_vm0, %v735_v13  ;;  %v1098_v1 = vpack.c.bf16 %v1093_v53, %v1092_v63  ;;  %v1094_v48 = vsel %vm3239_vm3, %v716_v18, 0.0  ;;  %v1095_v0 = vsel %vm3245_vm4, %v1086_v57, 0.0 }
 0x177   : > { %v736_v8 = vpack.c.bf16 %v732_v17, %v731_v16  ;;  %v1099_v6 = vpack.c.bf16 %v1095_v0, %v1094_v48  ;;  %v1202_v24 = vpack.c.bf16 %v3097_v34, %v3095_v33  ;;  %v1203_v40 = vpack.c.bf16 %v3105_v39, %v3099_v35  ;;  %v2691_v34 = vld [vmem:[%s3600_s3 + $0x48] sm:$0xff]  }
 0x178   : > { %v1204_v26 = vpack.c.bf16 %v3093_v32, %v3107_v44  ;;  %v1205_v63 = vpack.c.bf16 %v3111_v46, %v3109_v45  ;;  %v1314_v3 = vsel %vm3083_vm8, %v3219_v2, 0.0  ;;  %v1315_v13 = vsel %vm3089_vm9, %v3265_v15, 0.0 }
 0x179   : > { %vm3655_vm14 = vcmask 1046528   ;;  %v1320_v32 = vpack.c.bf16 %v1315_v13, %v1314_v3  ;;  %v1316_v35 = vsel %vm3123_vm11, %v3285_v56, 0.0  ;;  %v1426_v44 = vsel %vm3044_vm1, %v706_v10, 0.0  ;;  %2462 = vmatmul.mubr.msk.bf16.vlgmr.msra.gmra.mrb[0].mxu1 %vm448_vm0, %v1097_v60 }
 0x17a   : > { %v3360_v33 = vsel %vm3655_vm14, %v961_v20, %v3050_v42  ;;  %v1427_v2 = vsel %vm3101_vm10, %v708_v12, 0.0  ;;  %v1430_v20 = vsel %vm3195_vm15, %v714_v4, 0.0  ;;  %v1431_v27 = vsel %vm3201_vm7, %v716_v18, 0.0  ;;  %2470 = vmatpush3.bf16.msra.mxu1 %v3281_v51  ;;  %2465 = vmatprep.mubr.msk.bf16.mxu1 %vm448_vm0, %v1098_v1 }
 0x17b   : > { %v1317_v39 = vsel %vm3147_vm12, %v3360_v33, 0.0  ;;  %v1434_v5 = vpack.c.bf16 %v1427_v2, %v1426_v44  ;;  %v1436_v53 = vpack.c.bf16 %v1431_v27, %v1430_v20  ;;  %v1424_v16 = vsel %vm3656_vm5, %v1085_v49, %v3028_v55  ;;  %2471 = vmatprep.subr.bf16.mxu1 %v2691_v34 }
 0x17c   : > { %v1321_v45 = vpack.c.bf16 %v1317_v39, %v1316_v35  ;;  %v1432_v11 = vsel %vm3239_vm3, %v1086_v57, 0.0  ;;  %v1433_v38 = vsel %vm3245_vm4, %v1424_v16, 0.0  ;;  %v1640_v55 = vsel %vm3083_vm8, %v3265_v15, 0.0  ;;  %2442 = vmatmul.mubr.msk.bf16.gmra.mrb[12].mxu0 %vm448_vm0, %v736_v8 }
 0x17d   : > { %v1437_v61 = vpack.c.bf16 %v1433_v38, %v1432_v11  ;;  %v1642_v36 = vsel %vm3123_vm11, %v3360_v33, 0.0  ;;  %v1646_v28 = vpack.c.bf16 %v1641_v29, %v1640_v55  ;;  %v1752_v49 = vsub.s32 4, %v3002_v43 }
 0x17e   : > { %2472 = vmatpush3.bf16.msra.mxu1 %v2691_v34  ;;  %v1764_v60 = vsub.s32 5, %v3002_v43  ;;  %vm2789_vm4 = vmmov 0   ;;  %vm2025_vm8 = vcmask 64512  }
 0x17f   : > { %2481 = vmatprep.subr.bf16.mxu1 %v2692_v25 }
 0x180   : > { %v1765_v17 = vrot.slane %v3000_v41, %v1764_v60 }
 0x181   : > { %2466 = vmatmul.mubr.msk.bf16.gmra.mrb[4].mxu1 %vm448_vm0, %v1099_v6 }
 0x182   : > { %2473 = vmatprep.mubr.msk.bf16.mxu1 %vm448_vm0, %v1202_v24 }
 0x189   : > { %2474 = vmatmul.mubr.msk.bf16.vlgmr.msra.gmra.mrb[0].mxu1 %vm448_vm0, %v1203_v40 }
 0x18a   : > { %2482 = vmatpush3.bf16.msra.mxu1 %v2692_v25  ;;  %2477 = vmatprep.mubr.msk.bf16.mxu1 %vm448_vm0, %v1204_v26 }
 0x18b   : > { %2483 = vmatprep.subr.bf16.mxu1 %v2693_v22 }
 0x18e   : > { %2484 = vmatpush3.bf16.msra.mxu1 %v2693_v22 }
 0x18f   : > { %2493 = vmatprep.subr.bf16.mxu1 %v2694_v23 }
 0x191   : > { %2478 = vmatmul.mubr.msk.bf16.gmra.mrb[4].mxu1 %vm448_vm0, %v1205_v63 }
 0x192   : > { %2485 = vmatprep.mubr.msk.bf16.mxu1 %vm448_vm0, %v3205_v52  ;;  %v2699_v52 = vld [vmem:[%s3600_s3 + $0x88] sm:$0xff]  }
 0x199   : > { %2486 = vmatmul.mubr.msk.bf16.vlgmr.msra.gmra.mrb[0].mxu1 %vm448_vm0, %v3250_v62  ;;  %v1540_v62 = vpack.c.bf16 %v3659_v50, %v3111_v46  ;;  %v2700_v46 = vld [vmem:[%s3602_s5] sm:$0xff]  }
 0x19a   : > { %2494 = vmatpush3.bf16.msra.mxu1 %v2694_v23  ;;  %2489 = vmatprep.mubr.msk.bf16.mxu1 %vm448_vm0, %v1320_v32 }
 0x19b   : > { %2495 = vmatprep.subr.bf16.mxu1 %v2695_v58  ;;  %2529 = vmatprep.subr.bf16.mxu0 %v2700_v46 }
 0x19c   : > { %2530 = vmatpush3.bf16.msra.mxu0 %v2700_v46  ;;  %v2705_v46 = vld [vmem:[%s3603_s6 + $0x18] sm:$0xff]  }
 0x19e   : > { %2496 = vmatpush3.bf16.msra.mxu1 %v2695_v58 }
 0x19f   : > { %2505 = vmatprep.subr.bf16.mxu1 %v2696_v19 }
 0x1a1   : > { %2490 = vmatmul.mubr.msk.bf16.gmra.mrb[4].mxu1 %vm448_vm0, %v1321_v45 }
 0x1a2   : > { %2497 = vmatprep.mubr.msk.bf16.mxu1 %vm448_vm0, %v1434_v5 }
 0x1a9   : > { %2498 = vmatmul.mubr.msk.bf16.vlgmr.msra.gmra.mrb[0].mxu1 %vm448_vm0, %v3321_v37  ;;  %v1753_v37 = vrot.slane %v3000_v41, %v1752_v49 }
 0x1aa   : > { %2506 = vmatpush3.bf16.msra.mxu1 %v2696_v19  ;;  %2501 = vmatprep.mubr.msk.bf16.mxu1 %vm448_vm0, %v1436_v53 }
 0x1ab   : > { %2507 = vmatprep.subr.bf16.mxu1 %v2697_v21 }
 0x1ae   : > { %2508 = vmatpush3.bf16.msra.mxu1 %v2697_v21 }
 0x1af   : > { %2517 = vmatprep.subr.bf16.mxu1 %v2698_v30 }
 0x1b1   : > { %2502 = vmatmul.mubr.msk.bf16.gmra.mrb[4].mxu1 %vm448_vm0, %v1437_v61 }
 0x1b2   : > { %2509 = vmatprep.mubr.msk.bf16.mxu1 %vm448_vm0, %v3119_v54  ;;  %v1643_v54 = vsel %vm3147_vm12, %v3050_v42, 0.0 }
 0x1b9   : > { %2510 = vmatmul.mubr.msk.bf16.vlgmr.msra.gmra.mrb[0].mxu1 %vm448_vm0, %v3129_v59  ;;  %v1647_v59 = vpack.c.bf16 %v1643_v54, %v1642_v36  ;;  %v2703_v54 = vld [vmem:[%s3603_s6 + $0x8] sm:$0xff]  }
 0x1ba   : > { %2518 = vmatpush3.bf16.msra.mxu1 %v2698_v30  ;;  %2513 = vmatprep.mubr.msk.bf16.mxu1 %vm448_vm0, %v3142_v7  ;;  %v2701_v7 = vld [vmem:[%s3602_s5 + $0x8] sm:$0xff]  }
 0x1bb   : > { %2519 = vmatprep.subr.bf16.mxu1 %v2699_v52  ;;  %2531 = vmatprep.subr.bf16.mxu0 %v2701_v7 }
 0x1bc   : > { %2532 = vmatpush3.bf16.msra.mxu0 %v2701_v7  ;;  %v2706_v7 = vld [vmem:[%s3603_s6 + $0x20] sm:$0xff]  }
 0x1bd   : > { %2541 = vmatprep.subr.bf16.mxu0 %v3659_v50 }
 0x1be   : > { %2520 = vmatpush3.bf16.msra.mxu1 %v2699_v52 }
 0x1c1   : > { %2514 = vmatmul.mubr.msk.bf16.gmra.mrb[4].mxu1 %vm448_vm0, %v1540_v62  ;;  %v2702_v62 = vld [vmem:[%s3603_s6] sm:$0xff]  }
 0x1c2   : > { %2521 = vmatprep.mubr.msk.bf16.mxu1 %vm448_vm0, %v1644_v31 }
 0x1c9   : > { %2522 = vmatmul.mubr.msk.bf16.vlgmr.msra.gmra.mrb[0].mxu1 %vm448_vm0, %v3258_v14 }
 0x1ca   : > { %2525 = vmatprep.mubr.msk.bf16.mxu1 %vm448_vm0, %v1646_v28 }
 0x1d1   : > { %2526 = vmatmul.mubr.msk.bf16.gmra.mrb[4].mxu1 %vm448_vm0, %v1647_v59  ;;  %v2704_v59 = vld [vmem:[%s3603_s6 + $0x10] sm:$0xff]  }
 0x247   : > { %v2439_v14 = vpop.f32.mrb[8].mxu0 }
 0x248   : > { %v897_v9 = vpop.f32.mrb[9].mxu0 }
 0x249   : > { %v2440_v42 = vpop.f32.mrb[10].mxu0 }
 0x24a   : > { %v900_v15 = vpop.f32.mrb[11].mxu0 }
 0x24f   : > { %v2443_v51 = vpop.f32.mrb[12].mxu0 }
 0x250   : > { %v913_v56 = vpop.f32.mrb[13].mxu0 }
 0x251   : > { %v2444_v10 = vpop.f32.mrb[14].mxu0 }
 0x252   : > { %v916_v12 = vpop.f32.mrb[15].mxu0 }
 0x29c   : > { %v2523_v4 = vpop.f32.mrb[0].mxu1 }
 0x29d   : > { %v2567_v18 = vadd.f32 %v2523_v4, %v2439_v14  ;;  %v1711_v57 = vpop.f32.mrb[1].mxu1  ;;  %v2707_v14 = vld [vmem:[%s3603_s6 + $0x28] sm:$0xff]  }
 0x29e   : > { %v2568_v1 = vadd.f32 %v1711_v57, %v897_v9  ;;  %v2524_v8 = vpop.f32.mrb[2].mxu1  ;;  %v2708_v9 = vld [vmem:[%s3603_s6 + $0x30] sm:$0xff]  }
 0x29f   : > { %v1756_v48 = vmul.f32 %v2567_v18, %v1753_v37  ;;  %v2569_v0 = vadd.f32 %v2524_v8, %v2440_v42  ;;  %v1714_v6 = vpop.f32.mrb[3].mxu1  ;;  %v2709_v42 = vld [vmem:[%s3603_s6 + $0x38] sm:$0xff]  }
 0x2a0   : > { %v1754_v24 = vmul.f32 %v2568_v1, %v1753_v37  ;;  %v2570_v40 = vadd.f32 %v1714_v6, %v900_v15  ;;  %v306_v15 = vld [vmem:[%s3601_s4] sm:$0x3] }
 0x2a1   : > { %v1768_v26 = vadd.f32 %v1765_v17, %v1756_v48  ;;  %v1757_v63 = vmul.f32 %v2569_v0, %v1753_v37 }
 0x2a2   : > { %v1766_v3 = vadd.f32 %v1765_v17, %v1754_v24  ;;  %v1755_v13 = vmul.f32 %v2570_v40, %v1753_v37 }
 0x2a3   : > { %v1769_v33 = vadd.f32 %v1765_v17, %v1757_v63  ;;  %v1776_v35 = vmax.f32 %v1768_v26, 0.0 }
 0x2a4   : > { %v1767_v34 = vadd.f32 %v1765_v17, %v1755_v13  ;;  %v2527_v32 = vpop.f32.mrb[4].mxu1  ;;  %v1774_v41 = vmax.f32 %v1766_v3, 0.0 }
 0x2a5   : > { %v1777_v39 = vmax.f32 %v1769_v33, 0.0  ;;  %v2571_v44 = vadd.f32 %v2527_v32, %v2443_v51  ;;  %v1727_v45 = vpop.f32.mrb[5].mxu1  ;;  %v1882_v51 = vrot.slane %v306_v15, %v3007_v47 }
 0x2a6   : > { %v1775_v2 = vmax.f32 %v1767_v34, 0.0  ;;  %v2572_v20 = vadd.f32 %v1727_v45, %v913_v56  ;;  %v2528_v27 = vpop.f32.mrb[6].mxu1 }
 0x2a7   : > { %v1783_v5 = vpack.c.bf16 %v1777_v39, %v1776_v35  ;;  %v1760_v53 = vmul.f32 %v2571_v44, %v1753_v37  ;;  %v2573_v16 = vadd.f32 %v2528_v27, %v2444_v10  ;;  %v1730_v11 = vpop.f32.mrb[7].mxu1 }
 0x2a8   : > { %v1782_v38 = vpack.c.bf16 %v1775_v2, %v1774_v41  ;;  %v1758_v31 = vmul.f32 %v2572_v20, %v1753_v37  ;;  %v2574_v55 = vadd.f32 %v1730_v11, %v916_v12  ;;  %v3660_v12 = vsub.s32 1, %v3002_v43 }
 0x2a9   : > { %v1772_v25 = vadd.f32 %v1765_v17, %v1760_v53  ;;  %v1761_v61 = vmul.f32 %v2573_v16, %v1753_v37 }
 0x2aa   : > { %v1770_v29 = vadd.f32 %v1765_v17, %v1758_v31  ;;  %v1759_v36 = vmul.f32 %v2574_v55, %v1753_v37  ;;  %2533 = vmatprep.mubr.msk.bf16.mxu0 %vm448_vm0, %v1782_v38  ;;  %v1894_v49 = vrot.slane %v306_v15, %v3660_v12  ;;  %v2024_v55 = vld [vmem:[%s3604_s7] sm:$0xf] }
 0x2ab   : > { %v1773_v28 = vadd.f32 %v1765_v17, %v1761_v61  ;;  %2534 = vmatmul.mubr.msk.bf16.vlgmr.msra.gmra.mrb[16].mxu0 %vm448_vm0, %v1783_v5  ;;  %v1780_v23 = vmax.f32 %v1772_v25, 0.0 }
 0x2ac   : > { %v1771_v22 = vadd.f32 %v1765_v17, %v1759_v36  ;;  %v1778_v19 = vmax.f32 %v1770_v29, 0.0  ;;  %2542 = vmatpush3.bf16.msra.mxu0 %v2702_v62 }
 0x2ad   : > { %v1781_v58 = vmax.f32 %v1773_v28, 0.0  ;;  %2543 = vmatprep.subr.bf16.mxu0 %v3659_v50 }
 0x2ae   : > { %v1779_v21 = vmax.f32 %v1771_v22, 0.0 }
 0x2af   : > { %v1785_v30 = vpack.c.bf16 %v1781_v58, %v1780_v23 }
 0x2b0   : > { %v1784_v52 = vpack.c.bf16 %v1779_v21, %v1778_v19  ;;  %2544 = vmatpush3.bf16.msra.mxu0 %v2703_v54 }
 0x2b1   : > { %2545 = vmatprep.subr.bf16.mxu0 %v3659_v50 }
 0x2b2   : > { %2537 = vmatprep.mubr.msk.bf16.mxu0 %vm448_vm0, %v1784_v52 }
 0x2b3   : > { %2538 = vmatmul.mubr.msk.bf16.gmra.mrb[20].mxu0 %vm448_vm0, %v1785_v30  ;;  %vm2029_vm0 = vcmask 1043456  }
 0x2b4   : > { %2557 = vmatprep.mubr.msk.bf16.mxu0 %vm2789_vm4, %v3659_v50  ;;  %2546 = vmatpush3.bf16.msra.mxu0 %v2704_v59  ;;  %v2031_v29 = vsel %vm2029_vm0, %v2024_v55, 0 }
 0x2b5   : > { %2547 = vmatprep.subr.bf16.mxu0 %v3659_v50 }
 0x2b8   : > { %2548 = vmatpush3.bf16.msra.mxu0 %v2705_v46 }
 0x2b9   : > { %2549 = vmatprep.subr.bf16.mxu0 %v3659_v50 }
 0x2bc   : > { %2550 = vmatpush3.bf16.msra.mxu0 %v2706_v7 }
 0x2bd   : > { %2551 = vmatprep.subr.bf16.mxu0 %v3659_v50 }
 0x2c0   : > { %2552 = vmatpush3.bf16.msra.mxu0 %v2707_v14 }
 0x2c1   : > { %2553 = vmatprep.subr.bf16.mxu0 %v3659_v50 }
 0x2c4   : > { %2554 = vmatpush3.bf16.msra.mxu0 %v2708_v9 }
 0x2c5   : > { %2555 = vmatprep.subr.bf16.mxu0 %v3659_v50 }
 0x2c8   : > { %2556 = vmatpush3.bf16.msra.mxu0 %v2709_v42 }
 0x2c9   : > { %2561 = vmatprep.subr.bf16.mxu0 %v3659_v50 }
 0x37e   : > { %v2535_v56 = vpop.f32.mrb[16].mxu0 }
 0x37f   : > { %v1848_v10 = vpop.f32.mrb[17].mxu0  ;;  %v1885_v18 = vmul.f32 %v2535_v56, %v1882_v51 }
 0x380   : > { %v1883_v60 = vmul.f32 %v1882_v51, %v1848_v10  ;;  %v2536_v37 = vpop.f32.mrb[18].mxu0 }
 0x381   : > { %v1851_v4 = vpop.f32.mrb[19].mxu0  ;;  %v1886_v1 = vmul.f32 %v2536_v37, %v1882_v51  ;;  %v1897_v48 = vadd.f32 %v1894_v49, %v1885_v18  ;;  %v2717_v37 = vld [vmem:[%s2900_s10 + $0x8] sm:$0xff]  ;;  %v2718_v18 = vld [vmem:[%s2900_s10 + $0x10] sm:$0xff] }
 0x382   : > { %v1884_v17 = vmul.f32 %v1882_v51, %v1851_v4  ;;  %v1895_v57 = vadd.f32 %v1894_v49, %v1883_v60 }
 0x383   : > { %v1898_v40 = vadd.f32 %v1894_v49, %v1886_v1 }
 0x384   : > { %v1896_v8 = vadd.f32 %v1894_v49, %v1884_v17 }
 0x386   : > { %v1903_v0 = vadd.f32 %v1896_v8, %v1895_v57  ;;  %v2539_v6 = vpop.f32.mrb[20].mxu0 }
 0x387   : > { %v1864_v24 = vpop.f32.mrb[21].mxu0  ;;  %v1889_v33 = vmul.f32 %v2539_v6, %v1882_v51 }
 0x388   : > { %v1904_v26 = vadd.f32 %v1903_v0, %v1897_v48  ;;  %v1887_v63 = vmul.f32 %v1882_v51, %v1864_v24  ;;  %v2540_v3 = vpop.f32.mrb[22].mxu0  ;;  %v2721_v0 = vld [vmem:[%s2900_s10 + $0x28] sm:$0xff]  ;;  %v2722_v24 = vld [vmem:[%s2900_s10 + $0x30] sm:$0xff] }
 0x389   : > { %v1867_v13 = vpop.f32.mrb[23].mxu0  ;;  %v1890_v39 = vmul.f32 %v2540_v3, %v1882_v51  ;;  %v1901_v45 = vadd.f32 %v1894_v49, %v1889_v33 }
 0x38a   : > { %v1899_v43 = vadd.f32 %v1894_v49, %v1887_v63  ;;  %v1905_v34 = vadd.f32 %v1904_v26, %v1898_v40  ;;  %v1888_v32 = vmul.f32 %v1882_v51, %v1867_v13  ;;  %v2723_v26 = vld [vmem:[%s2900_s10 + $0x38] sm:$0xff] }
 0x38b   : > { %v1902_v2 = vadd.f32 %v1894_v49, %v1890_v39 }
 0x38c   : > { %v1906_v35 = vadd.f32 %v1905_v34, %v1899_v43  ;;  %v1900_v44 = vadd.f32 %v1894_v49, %v1888_v32 }
 0x38e   : > { %v1907_v41 = vadd.f32 %v1906_v35, %v1900_v44 }
 0x390   : > { %v1908_v20 = vadd.f32 %v1907_v41, %v1901_v45 }
 0x392   : > { %v1909_v27 = vadd.f32 %v1908_v20, %v1902_v2 }
 0x394   : > { %v1910_v5 = vrot.slane %v1909_v27, 4 }
 0x396   : > { %v1911_v53 = vadd.f32 %v1910_v5, %v1909_v27 }
 0x398   : > { %v1912_v16 = vrot.slane %v1911_v53, 2 }
 0x39a   : > { %v1913_v11 = vadd.f32 %v1912_v16, %v1911_v53 }
 0x39c   : > { %v1914_v38 = vrot.slane %v1913_v11, 1 }
 0x39e   : > { %v1915_v31 = vadd.f32 %v1914_v38, %v1913_v11 }
 0x3a0   : > { %v1916_v25 = vmul.f32 0.015625, %v1915_v31 }
 0x3a2   : > { %v1917_v61 = vpack.c.bf16 %v1916_v25, %v1916_v25 }
 0x3a4   : > { %2558 = vmatmul.mubr.bf16.vlgmr.msra.gmra.mrb[24].mxu0 %v1917_v61 }
 0x3a5   : > { %2562 = vmatpush3.bf16.msra.mxu0 %v2031_v29  ;;  %2563 = vmatprep.mubr.msk.bf16.mxu0 %vm2789_vm4, %v3659_v50 }
 0x477   : > { %v2016_v36 = vpop.f32.mrb[24].mxu0 }
 0x478   : > { %v2022_v28 = vmax.f32 %v2016_v36, 0.0  ;;  %v2559_v22 = vpop.f32.mrb[25].mxu0 }
 0x479   : > { %v2019_v23 = vpop.f32.mrb[26].mxu0 }
 0x47a   : > { %v2023_v58 = vpack.c.bf16 %v2022_v28, %v2022_v28  ;;  %v2560_v19 = vpop.f32.mrb[27].mxu0 }
 0x47c   : > { %2564 = vmatmul.mubr.msk.bf16.vlgmr.msra.gmra.mrb[28].mxu0 %vm2025_vm8, %v2023_v58 }
 0x54f   : > { %v2067_v21 = vpop.f32.mrb[28].mxu0 }
 0x550   : > { %v2073_v30 = vsub.f32 0.0, %v2067_v21  ;;  %v2565_v52 = vpop.f32.mrb[29].mxu0 }
 0x551   : > { %v2070_v62 = vpop.f32.mrb[30].mxu0 }
 0x552   : > { %v2074_v54 = vmul.f32 1.442695, %v2073_v30  ;;  %v2566_v59 = vpop.f32.mrb[31].mxu0 }
 0x554   : > { %2712 = vpow2.f32 %v2074_v54 }
 0x55e   : > { %v2713_v46 = vpop.eup %2712 }
 0x55f   : > { %v2076_v50 = vadd.f32 1.0, %v2713_v46 }
 0x561   : > { %2714 = vrcp.f32 %v2076_v50 }
 0x56b   : > { %v2715_v7 = vpop.eup %2714 }
 0x56c   : > { %v2082_v14 = vrot.slane %v2715_v7, %v3007_v47  ;;  %v2716_v47 = vld [vmem:[%s2900_s10] sm:$0xff] }
 0x56e   : > { %v2083_v9 = vmul.f32 %v2082_v14, %v1895_v57  ;;  %v2084_v42 = vmul.f32 %v2082_v14, %v1896_v8  ;;  %v2085_v15 = vmul.f32 %v2082_v14, %v1897_v48  ;;  %v2086_v51 = vmul.f32 %v2082_v14, %v1898_v40  ;;  %v2719_v57 = vld [vmem:[%s2900_s10 + $0x18] sm:$0xff]  ;;  %v2720_v8 = vld [vmem:[%s2900_s10 + $0x20] sm:$0xff]  ;;  %s3556_s10 = scalar_lea.sflag [#allocation3], %s296_s12 }
 0x56f   : > { %v2087_v56 = vmul.f32 %v2082_v14, %v1899_v43  ;;  %v2088_v10 = vmul.f32 %v2082_v14, %v1900_v44  ;;  %v2089_v12 = vmul.f32 %v2082_v14, %v1901_v45  ;;  %v2090_v49 = vmul.f32 %v2082_v14, %v1902_v2 }
 0x570   : > { %v2091_v60 = vadd.f32 %v2716_v47, %v2083_v9  ;;  %v2092_v4 = vadd.f32 %v2717_v37, %v2084_v42  ;;  %v2093_v17 = vadd.f32 %v2718_v18, %v2085_v15  ;;  %v2094_v1 = vadd.f32 %v2719_v57, %v2086_v51 }
 0x571   : > { %v2095_v48 = vadd.f32 %v2720_v8, %v2087_v56  ;;  %v2096_v6 = vadd.f32 %v2721_v0, %v2088_v10  ;;  %v2097_v40 = vadd.f32 %v2722_v24, %v2089_v12  ;;  %v2098_v63 = vadd.f32 %v2723_v26, %v2090_v49 }
 0x572   : > { %v2099_v3 = vmax.f32 %v2091_v60, 0.0  ;;  %v2100_v13 = vmax.f32 %v2092_v4, 0.0  ;;  %v2101_v33 = vmax.f32 %v2093_v17, 0.0  ;;  %v2102_v43 = vmax.f32 %v2094_v1, 0.0 }
 0x573   : > { %v2103_v34 = vmax.f32 %v2095_v48, 0.0  ;;  %v2104_v32 = vmax.f32 %v2096_v6, 0.0  ;;  %v2105_v35 = vmax.f32 %v2097_v40, 0.0  ;;  %v2106_v39 = vmax.f32 %v2098_v63, 0.0 }
 0x574   : > { %2107 = vst [vmem:[%s3528_s18] sm:$0xff] %v2099_v3  ;;  %2108 = vst [vmem:[%s3528_s18 + $0x8] sm:$0xff] %v2100_v13 }
 0x575   : > { %2109 = vst [vmem:[%s3528_s18 + $0x10] sm:$0xff] %v2101_v33  ;;  %2110 = vst [vmem:[%s3528_s18 + $0x18] sm:$0xff] %v2102_v43 }
 0x576   : > { %2111 = vst [vmem:[%s3528_s18 + $0x20] sm:$0xff] %v2103_v34  ;;  %2112 = vst [vmem:[%s3528_s18 + $0x28] sm:$0xff] %v2104_v32 }
 0x577   : > { %2113 = vst [vmem:[%s3528_s18 + $0x30] sm:$0xff] %v2105_v35  ;;  %2114 = vst [vmem:[%s3528_s18 + $0x38] sm:$0xff] %v2106_v39 }
 0x578   : > { %2737 = shalt.err (!%p2734_p3)
}
 0x579   : > { %s2738_s26 = scalar_lea.hbm %s3542_s21, 1024  ;;  %s2742_s17 = scalar_lea.hbm %s3605_s8, 2048 }
 0x57a   : > { %p2739_p4 = scmp.ne.s32.totalorder %s3542_s21, %s2738_s26  ;;  %p2743_p9 = scmp.lt.u32.totalorder %s3542_s21, %s3605_s8 }
 0x57b   : > { %p2744_p10 = scmp.lt.u32.totalorder %s2742_s17, %s2738_s26  ;;  %p2746_p12 = scmp.lt.u32.totalorder %s2738_s26, %s3542_s21 }
 0x57c   : > { %p2740_p7 = pnand %p2739_p4, %p2876_p5 }
 0x57d   : > { %p2745_p11 = por %p2744_p10, %p2743_p9 }
 0x57e   : > { %p2741_p8 = pneg %p2740_p7 }
 0x57f   : > { %p2747_p13 = por %p2746_p12, %p2745_p11 }
 0x581   : > { %p2748_p0 = pnand %p2747_p13, %p2741_p8 }
 0x583   : > { %2751 = shalt.err (!%p2748_p0)
}
 0x584   : > { %s2791_s20 = smov 128   ;;  %s2792_s22 = smov 8  }
 0x585   : > { %2631 = dma.vmem_to_hbm [thread:$0]  (%p2876_p5), %s3544_s19, 1024, %s3542_s21, %s3556_s10, %s2791_s20, %s2791_s20, %s2792_s22  }
 0x586 PF: > { %p2637_p1 = scmp.ge.s32.totalorder %s2786_s30, 2  ;;  %s2144_s23 = sand.u32 1, %s2774_s27  }
 0x587   : > { %s2145_s24 = scalar_lea.sflag [#allocation3], %s2144_s23 }
 0x588   : > { %p2634_p2 = pnand %p2637_p1, %p2880_p6 }
 0x58a   : > { %2769 = dma.done.wait (!%p2634_p2), %s2145_s24, 1024  }
 0x58b   : > { %2771 = vsyncadd (!%p2634_p2), %s2145_s24, 4294966272  ;;  %p18_p3 = scmp.ge.s32.totalorder %s2863_s11, 4   ;;  %s3661_s27 = smov %s2778_s28 }
 0x58c   : > { %s3662_s28 = smov %s2782_s29  ;;  %s3663_s29 = smov %s2874_s14 }
 0x58d   : > { %s3664_s30 = smov %s2863_s11  ;;  %20 = sbr.rel (!%p18_p3) target bundleno = 3 (0x3), region = 95 }
 0x594   :  { %2150 = vsyncpa [#allocation3], 1 }
 0x595   :  { %2152 = vsyncpa [#allocation3 + $0x1], 1 }

</bundles_post_ra>
